<compile_context>
chip_gen: v5e
topology: v5e:2x2
jax: 0.10.0
libtpu: 0.0.40
codegen_flags: <defaults>
</compile_context>

<pallas_src>
import math

import jax
import jax.numpy as jnp
from jax import lax
from jax.experimental import pallas as pl
from jax.experimental.pallas import tpu as pltpu


def _pick_tile(dim, target, quantum):
    """Largest quantum-aligned tile <= target that divides dim (else full dim)."""
    if dim <= target:
        return dim
    t = (target // quantum) * quantum
    while t >= quantum:
        if dim % t == 0:
            return t
        t -= quantum
    return dim


def _pick_sub(chunk, target=16):
    """Sub-chunk length for the GLA recurrence (divides chunk, <= target)."""
    if chunk % target == 0:
        return target
    if chunk % 8 == 0:
        return 8
    return chunk


# ----------------------------------------------------------------------------
# Kernel 1: depthwise causal conv1d (kernel_size=4) + SiLU, chunked along L.
# A (K-1, Dt) halo of the previous chunk's last rows is carried in VMEM scratch
# so no HBM-side padding / full-L residency is needed.
# ----------------------------------------------------------------------------
def _conv1d_silu_kernel(x_ref, w_ref, o_ref, halo_ref):
    # x_ref: (1, CL, Dt), w_ref: (K, Dt), o_ref: (1, CL, Dt), halo: (K-1, Dt)
    c = pl.program_id(2)
    K = w_ref.shape[0]
    CL = o_ref.shape[1]

    @pl.when(c == 0)
    def _():
        halo_ref[...] = jnp.zeros_like(halo_ref)

    x = x_ref[0]                                                  # native dtype
    xp = jnp.concatenate([halo_ref[...], x], axis=0).astype(jnp.float32)
    w = w_ref[...].astype(jnp.float32)

    acc = xp[K - 1:K - 1 + CL, :] * w[K - 1:K, :]
    for tap in range(K - 1):                       # static unroll over taps
        acc = acc + xp[tap:tap + CL, :] * w[tap:tap + 1, :]
    o_ref[0] = (acc * jax.nn.sigmoid(acc)).astype(o_ref.dtype)    # SiLU

    halo_ref[...] = x[CL - (K - 1):, :]            # carry last K-1 rows


# ----------------------------------------------------------------------------
# Kernel 2: fused [q | k_gate | v | g] projection.
# Tiled matmul over (B, L-tiles, K-tiles), f32 accumulator, 4 separate outputs
# written at the last K step (g gets its bias).
# ----------------------------------------------------------------------------
def _make_proj_kernel(dk, D):
    def kernel(x_ref, w_ref, b_ref, q_ref, kg_ref, v_ref, g_ref, acc_ref):
        k = pl.program_id(2)

        @pl.when(k == 0)
        def _():
            acc_ref[...] = jnp.zeros_like(acc_ref)

        # native-dtype operands to the MXU, f32 accumulation
        acc_ref[...] += jnp.dot(x_ref[0], w_ref[...],
                                preferred_element_type=jnp.float32)

        @pl.when(k == pl.num_programs(2) - 1)
        def _():
            acc = acc_ref[...]
            q_ref[0] = acc[:, :dk].astype(q_ref.dtype)
            kg_ref[0] = acc[:, dk:2 * dk].astype(kg_ref.dtype)
            v_ref[0] = acc[:, 2 * dk:2 * dk + D].astype(v_ref.dtype)
            g_ref[0] = (acc[:, 2 * dk + D:]
                        + b_ref[...].astype(jnp.float32)).astype(g_ref.dtype)

    return kernel


# ----------------------------------------------------------------------------
# Kernel 3: chunked MetaLA core (GLA recurrence + self-aug + group norm).
# Grid = (B, L/C); all heads processed per chunk; per-head (Dk, Dv) recurrent
# state carried in a VMEM scratch across the chunk axis.  Inside a chunk the
# recurrence advances in sub-chunks of S rows so every exp() argument is
# bounded by S*|gk| (numerically safe for strongly negative gates).
# ----------------------------------------------------------------------------
def _make_metala_kernel(H, key_dim, head_dim, S):
    def kernel(q_ref, kg_ref, v_ref, ab_ref, o_ref, s_ref, s_scr):
        c = pl.program_id(1)

        @pl.when(c == 0)
        def _():
            s_scr[...] = jnp.zeros_like(s_scr)

        q = q_ref[0].astype(jnp.float32)       # (C, dk)
        kg = kg_ref[0].astype(jnp.float32)     # (C, dk)
        v = v_ref[0].astype(jnp.float32)       # (C, D)
        ab = ab_ref[...].astype(jnp.float32)   # (1, dk)

        C = q.shape[0]
        nsub = C // S
        scale = key_dim ** -0.5

        gk = jax.nn.log_sigmoid(kg) * (1.0 / 16.0)   # <= 0
        kk = 1.0 - jnp.exp(gk)
        qkab = q * kk * ab                           # self-aug weights (C, dk)

        # per-sub-chunk inclusive cumulative log-decay via small S x S matmuls
        srow = lax.broadcasted_iota(jnp.int32, (S, S), 0)
        scol = lax.broadcasted_iota(jnp.int32, (S, S), 1)
        causal_s = srow >= scol
        tri = jnp.where(causal_s, 1.0, 0.0)

        qe_b, ke_b, kd_b, dec_b = [], [], [], []
        for s in range(nsub):                        # static unroll (nsub <= 16)
            rs = slice(s * S, (s + 1) * S)
            gk_s = gk[rs]                                           # (S, dk)
            A_s = jnp.dot(tri, gk_s, preferred_element_type=jnp.float32)
            a_end = A_s[S - 1:S, :]                                 # (1, dk)
            qe_b.append(q[rs] * jnp.exp(A_s) * scale)   # exp <= 1
            ke_b.append(kk[rs] * jnp.exp(-A_s))         # exp <= exp(S*|gk|)
            kd_b.append(kk[rs] * jnp.exp(a_end - A_s))  # exp <= 1
            dec_b.append(jnp.exp(a_end).T)              # (dk, 1), <= 1

        pieces = []
        for h in range(H):                             # static unroll over heads
            ks = slice(h * key_dim, (h + 1) * key_dim)
            vs = slice(h * head_dim, (h + 1) * head_dim)
            st = s_scr[h]                              # (Kd, Dv) carried state

            rows_out = []
            for s in range(nsub):
                rs = slice(s * S, (s + 1) * S)
                v_b = v[rs, vs]
                qe_s = qe_b[s][:, ks]
                ke_s = ke_b[s][:, ks]
                kd_s = kd_b[s][:, ks]

                # inter(-sub)-chunk contribution from the carried state
                o_b = jnp.dot(qe_s, st, preferred_element_type=jnp.float32)
                # intra-sub-chunk causal attention
                attn = lax.dot_general(qe_s, ke_s, (((1,), (1,)), ((), ())),
                                       preferred_element_type=jnp.float32)
                attn = jnp.where(causal_s, attn, 0.0)
                o_b = o_b + jnp.dot(attn, v_b, preferred_element_type=jnp.float32)

                # carry state: S <- diag(exp(A_end)) S + kd^T v
                st = st * dec_b[s][ks, :] + lax.dot_general(
                    kd_s, v_b, (((0,), (0,)), ((), ())),
                    preferred_element_type=jnp.float32)
                rows_out.append(o_b)

            s_scr[h] = st
            o_h = rows_out[0] if nsub == 1 else jnp.concatenate(rows_out, axis=0)

            # self augmentation: o += sigmoid((q . (k*aug_balance)) * v)
            aug_w = jnp.sum(qkab[:, ks], axis=-1, keepdims=True)   # (C, 1)
            o_h = o_h + jax.nn.sigmoid(aug_w * v[:, vs])

            # group norm = LayerNorm over head_dim, eps=1e-5, no affine
            mean = jnp.mean(o_h, axis=-1, keepdims=True)
            var = jnp.mean(jnp.square(o_h - mean), axis=-1, keepdims=True)
            pieces.append((o_h - mean) * lax.rsqrt(var + 1e-5))

        o_full = pieces[0] if H == 1 else jnp.concatenate(pieces, axis=-1)
        o_ref[0] = o_full.astype(o_ref.dtype)

        @pl.when(c == pl.num_programs(1) - 1)
        def _():
            s_ref[0] = s_scr[...].astype(s_ref.dtype)

    return kernel


# ----------------------------------------------------------------------------
# Kernel 4: output = (silu(g) * o) @ W_out, tiled matmul with f32 accumulator.
# ----------------------------------------------------------------------------
def _gated_outproj_kernel(g_ref, o_ref, w_ref, y_ref, acc_ref):
    k = pl.program_id(2)

    @pl.when(k == 0)
    def _():
        acc_ref[...] = jnp.zeros_like(acc_ref)

    g = g_ref[0].astype(jnp.float32)
    gated = (g * jax.nn.sigmoid(g)
             * o_ref[0].astype(jnp.float32)).astype(g_ref.dtype)
    acc_ref[...] += jnp.dot(gated, w_ref[...],
                            preferred_element_type=jnp.float32)

    @pl.when(k == pl.num_programs(2) - 1)
    def _():
        y_ref[0] = acc_ref[...].astype(y_ref.dtype)


# ----------------------------------------------------------------------------
# Python wrapper (no transposes, no HBM padding, no activation slicing)
# ----------------------------------------------------------------------------
def qv_metala_self_aug_forward(x, params, num_heads):
    B, L, D = x.shape
    H = num_heads
    dk = D // 2
    head_dim = D // H
    key_dim = dk // H
    n_all = 2 * dk + 2 * D

    # tile / chunk sizes (full dim at small test shapes, aligned tiles at scale)
    d_tile = _pick_tile(D, 256, 128)   # conv channel tile
    cl = _pick_tile(L, 512, 8)         # conv L chunk
    tml = _pick_tile(L, 256, 8)        # matmul row tile (along L)
    tk = _pick_tile(D, 128, 128)       # matmul contraction tile
    C = _pick_tile(L, 128, 8)          # GLA chunk along L
    S = _pick_sub(C, 16)               # GLA sub-chunk (numerical stability)

    # --- 1. causal depthwise conv1d + SiLU (chunked, carried halo) -----------
    conv_w = params["conv_w"]                          # (K, D)
    Kc = conv_w.shape[0]
    x_conv = pl.pallas_call(
        _conv1d_silu_kernel,
        grid=(B, D // d_tile, L // cl),
        in_specs=[pl.BlockSpec((1, cl, d_tile), lambda b, d, c: (b, c, d)),
                  pl.BlockSpec((Kc, d_tile), lambda b, d, c: (0, d))],
        out_specs=pl.BlockSpec((1, cl, d_tile), lambda b, d, c: (b, c, d)),
        out_shape=jax.ShapeDtypeStruct((B, L, D), x.dtype),
        scratch_shapes=[pltpu.VMEM((Kc - 1, d_tile), x.dtype)],
        compiler_params=pltpu.CompilerParams(
            dimension_semantics=("parallel", "parallel", "arbitrary")),
    )(x, conv_w)

    # --- 2. fused projections [q | k_gate | v | g] --------------------------
    w_all = jnp.concatenate(
        [params["w_q"], params["w_kg"], params["w_v"], params["w_g"]], axis=1)
    b_g = params["b_g"].reshape(1, D)
    q, kg, v, g = pl.pallas_call(
        _make_proj_kernel(dk, D),
        grid=(B, L // tml, D // tk),
        in_specs=[
            pl.BlockSpec((1, tml, tk), lambda b, m, k: (b, m, k)),
            pl.BlockSpec((tk, n_all), lambda b, m, k: (k, 0)),
            pl.BlockSpec((1, D), lambda b, m, k: (0, 0)),
        ],
        out_specs=[
            pl.BlockSpec((1, tml, dk), lambda b, m, k: (b, m, 0)),
            pl.BlockSpec((1, tml, dk), lambda b, m, k: (b, m, 0)),
            pl.BlockSpec((1, tml, D), lambda b, m, k: (b, m, 0)),
            pl.BlockSpec((1, tml, D), lambda b, m, k: (b, m, 0)),
        ],
        out_shape=[
            jax.ShapeDtypeStruct((B, L, dk), x.dtype),
            jax.ShapeDtypeStruct((B, L, dk), x.dtype),
            jax.ShapeDtypeStruct((B, L, D), x.dtype),
            jax.ShapeDtypeStruct((B, L, D), x.dtype),
        ],
        scratch_shapes=[pltpu.VMEM((tml, n_all), jnp.float32)],
        compiler_params=pltpu.CompilerParams(
            dimension_semantics=("parallel", "parallel", "arbitrary")),
    )(x_conv, w_all, b_g)

    # --- 3. chunked MetaLA (GLA + self-aug + group norm) ---------------------
    ab = params["aug_balance"].reshape(1, dk).astype(jnp.float32)
    o, state = pl.pallas_call(
        _make_metala_kernel(H, key_dim, head_dim, S),
        grid=(B, L // C),
        in_specs=[
            pl.BlockSpec((1, C, dk), lambda b, c: (b, c, 0)),
            pl.BlockSpec((1, C, dk), lambda b, c: (b, c, 0)),
            pl.BlockSpec((1, C, D), lambda b, c: (b, c, 0)),
            pl.BlockSpec((1, dk), lambda b, c: (0, 0)),
        ],
        out_specs=[
            pl.BlockSpec((1, C, D), lambda b, c: (b, c, 0)),
            pl.BlockSpec((1, H, key_dim, head_dim), lambda b, c: (b, 0, 0, 0)),
        ],
        out_shape=[
            jax.ShapeDtypeStruct((B, L, D), x.dtype),
            jax.ShapeDtypeStruct((B, H, key_dim, head_dim), jnp.float32),
        ],
        scratch_shapes=[pltpu.VMEM((H, key_dim, head_dim), jnp.float32)],
        compiler_params=pltpu.CompilerParams(
            dimension_semantics=("parallel", "arbitrary")),
    )(q, kg, v, ab)

    # --- 4. output = out_proj(silu(g) * o) -----------------------------------
    y = pl.pallas_call(
        _gated_outproj_kernel,
        grid=(B, L // tml, D // tk),
        in_specs=[
            pl.BlockSpec((1, tml, tk), lambda b, m, k: (b, m, k)),
            pl.BlockSpec((1, tml, tk), lambda b, m, k: (b, m, k)),
            pl.BlockSpec((tk, D), lambda b, m, k: (k, 0)),
        ],
        out_specs=pl.BlockSpec((1, tml, D), lambda b, m, k: (b, m, 0)),
        out_shape=jax.ShapeDtypeStruct((B, L, D), x.dtype),
        scratch_shapes=[pltpu.VMEM((tml, D), jnp.float32)],
        compiler_params=pltpu.CompilerParams(
            dimension_semantics=("parallel", "parallel", "arbitrary")),
    )(g, o, params["w_out"])

    return y, state, None   # (output, new_hidden_state, conv_state)


# ----------------------------------------------------------------------------
# Deterministic parameter construction (shapes from the module __init__)
# ----------------------------------------------------------------------------
def make_params(key, embed_dim, num_heads, d_conv=4):
    D = embed_dim
    dk = D // 2
    ks = jax.random.split(key, 8)

    def xavier(k, fan_in, fan_out, gain):
        bound = gain * math.sqrt(6.0 / (fan_in + fan_out))
        return jax.random.uniform(k, (fan_in, fan_out), jnp.float32, -bound, bound)

    gain_qk = 2 ** (-2.5)
    params = {
        # stored (in, out) so kernels compute x @ W  (== torch Linear with W.T)
        "w_q": xavier(ks[0], D, dk, gain_qk),
        "w_kg": xavier(ks[1], D, dk, gain_qk),
        "w_v": xavier(ks[2], D, D, 1.0),
        "w_g": xavier(ks[3], D, D, 1.0),
        "b_g": 0.02 * jax.random.normal(ks[4], (D,), jnp.float32),
        "w_out": xavier(ks[5], D, D, 1.0),
        # module inits aug_balance to zeros; use a small deterministic nonzero
        # value so the self-augmentation path is actually exercised.
        "aug_balance": 0.1 * jax.random.normal(ks[6], (dk,), jnp.float32),
        # torch conv weight is (D, 1, K); kernel wants taps-major (K, D)
        "conv_w": (0.2 * jax.random.normal(ks[7], (D, d_conv), jnp.float32)).T,
    }
    return params


if __name__ == "__main__":
    B, L, D, H = 2, 8, 32, 2   # batch, seq, embed_dim, num_heads

    root = jax.random.PRNGKey(0)
    k_params, k_x = jax.random.split(root)
    params = make_params(k_params, D, H)
    x = jax.random.normal(k_x, (B, L, D), jnp.float32)

    fwd = jax.jit(lambda xx: qv_metala_self_aug_forward(xx, params, H))
    y, state, conv_state = fwd(x)
    jax.block_until_ready((y, state))

    assert y.shape == (B, L, D)
    assert state.shape == (B, H, (D // 2) // H, D // H)
    print("KERNEL_OK")
</pallas_src>

<mosaic_0001>
module attributes {stable_mosaic.version = 11 : i64} {
  func.func @_conv1d_silu_kernel(%arg0: i32, %arg1: i32, %arg2: i32, %arg3: memref<1x8x32xf32, #tpu.memory_space<vmem>>, %arg4: memref<4x32xf32, #tpu.memory_space<vmem>>, %arg5: memref<1x8x32xf32, #tpu.memory_space<vmem>>, %arg6: memref<3x32xf32, #tpu.memory_space<vmem>>) attributes {dimension_semantics = [#tpu.dimension_semantics<parallel>, #tpu.dimension_semantics<parallel>, #tpu.dimension_semantics<arbitrary>], iteration_bounds = array<i64: 2, 1, 1>, scalar_prefetch = 0 : i64, scratch_operands = 1 : i64, tpu.core_type = #tpu.core_type<tc>, window_params = [{transform_indices = @transform_0, window_bounds = array<i64: 1, 8, 32>}, {transform_indices = @transform_1, window_bounds = array<i64: 4, 32>}, {transform_indices = @transform_2, window_bounds = array<i64: 1, 8, 32>}]} {
    %c0_i32 = arith.constant 0 : i32
    %0 = arith.cmpi eq, %arg2, %c0_i32 : i32
    %1 = arith.extui %0 : i1 to i32
    %c0_i32_0 = arith.constant 0 : i32
    %2 = arith.cmpi ne, %1, %c0_i32_0 : i32
    scf.if %2 {
      %cst_12 = arith.constant 0.000000e+00 : f32
      %38 = vector.broadcast %cst_12 : f32 to vector<3x32xf32>
      %c0_13 = arith.constant 0 : index
      %c0_14 = arith.constant 0 : index
      %39 = vector.load %arg6[%c0_13, %c0_14] : memref<3x32xf32, #tpu.memory_space<vmem>>, vector<3x32xf32>
      tpu.vector_store %arg6[%c0_13, %c0_14], %38 {strides = array<i32>} : memref<3x32xf32, #tpu.memory_space<vmem>>, vector<3x32xf32>,
    } else {
    }
    %c0 = arith.constant 0 : index
    %c0_1 = arith.constant 0 : index
    %c0_2 = arith.constant 0 : index
    %3 = vector.load %arg3[%c0, %c0_1, %c0_2] : memref<1x8x32xf32, #tpu.memory_space<vmem>>, vector<1x8x32xf32>
    %4 = vector.shape_cast %3 : vector<1x8x32xf32> to vector<8x32xf32>
    %c0_3 = arith.constant 0 : index
    %c0_4 = arith.constant 0 : index
    %5 = vector.load %arg6[%c0_3, %c0_4] : memref<3x32xf32, #tpu.memory_space<vmem>>, vector<3x32xf32>
    %6 = tpu.concatenate %5, %4 in 0 : vector<3x32xf32>, vector<8x32xf32> -> vector<11x32xf32>
    %c0_5 = arith.constant 0 : index
    %c0_6 = arith.constant 0 : index
    %7 = vector.load %arg4[%c0_5, %c0_6] : memref<4x32xf32, #tpu.memory_space<vmem>>, vector<4x32xf32>
    %8 = vector.extract_strided_slice %6 {offsets = [3, 0], sizes = [8, 32], strides = [1, 1]} : vector<11x32xf32> to vector<8x32xf32>
    %9 = vector.extract_strided_slice %7 {offsets = [3, 0], sizes = [1, 32], strides = [1, 1]} : vector<4x32xf32> to vector<1x32xf32>
    %10 = vector.broadcast %9 : vector<1x32xf32> to vector<8x32xf32>
    %11 = arith.mulf %8, %10 : vector<8x32xf32>
    %12 = vector.extract_strided_slice %6 {offsets = [0, 0], sizes = [8, 32], strides = [1, 1]} : vector<11x32xf32> to vector<8x32xf32>
    %13 = vector.extract_strided_slice %7 {offsets = [0, 0], sizes = [1, 32], strides = [1, 1]} : vector<4x32xf32> to vector<1x32xf32>
    %14 = vector.broadcast %13 : vector<1x32xf32> to vector<8x32xf32>
    %15 = arith.mulf %12, %14 : vector<8x32xf32>
    %16 = arith.addf %11, %15 : vector<8x32xf32>
    %17 = vector.extract_strided_slice %6 {offsets = [1, 0], sizes = [8, 32], strides = [1, 1]} : vector<11x32xf32> to vector<8x32xf32>
    %18 = vector.extract_strided_slice %7 {offsets = [1, 0], sizes = [1, 32], strides = [1, 1]} : vector<4x32xf32> to vector<1x32xf32>
    %19 = vector.broadcast %18 : vector<1x32xf32> to vector<8x32xf32>
    %20 = arith.mulf %17, %19 : vector<8x32xf32>
    %21 = arith.addf %16, %20 : vector<8x32xf32>
    %22 = vector.extract_strided_slice %6 {offsets = [2, 0], sizes = [8, 32], strides = [1, 1]} : vector<11x32xf32> to vector<8x32xf32>
    %23 = vector.extract_strided_slice %7 {offsets = [2, 0], sizes = [1, 32], strides = [1, 1]} : vector<4x32xf32> to vector<1x32xf32>
    %24 = vector.broadcast %23 : vector<1x32xf32> to vector<8x32xf32>
    %25 = arith.mulf %22, %24 : vector<8x32xf32>
    %26 = arith.addf %21, %25 : vector<8x32xf32>
    %27 = arith.negf %26 : vector<8x32xf32>
    %28 = math.exp %27 : vector<8x32xf32>
    %cst = arith.constant 1.000000e+00 : f32
    %29 = vector.broadcast %cst : f32 to vector<8x32xf32>
    %30 = arith.addf %29, %28 : vector<8x32xf32>
    %31 = arith.divf %29, %30 : vector<8x32xf32>
    %32 = arith.mulf %26, %31 : vector<8x32xf32>
    %c0_7 = arith.constant 0 : index
    %c0_8 = arith.constant 0 : index
    %c0_9 = arith.constant 0 : index
    %33 = vector.load %arg5[%c0_7, %c0_8, %c0_9] : memref<1x8x32xf32, #tpu.memory_space<vmem>>, vector<1x8x32xf32>
    %34 = vector.shape_cast %33 : vector<1x8x32xf32> to vector<8x32xf32>
    %35 = vector.shape_cast %32 : vector<8x32xf32> to vector<1x8x32xf32>
    tpu.vector_store %arg5[%c0_7, %c0_8, %c0_9], %35 {strides = array<i32>} : memref<1x8x32xf32, #tpu.memory_space<vmem>>, vector<1x8x32xf32>,
    %36 = vector.extract_strided_slice %4 {offsets = [5, 0], sizes = [3, 32], strides = [1, 1]} : vector<8x32xf32> to vector<3x32xf32>
    %c0_10 = arith.constant 0 : index
    %c0_11 = arith.constant 0 : index
    %37 = vector.load %arg6[%c0_10, %c0_11] : memref<3x32xf32, #tpu.memory_space<vmem>>, vector<3x32xf32>
    tpu.vector_store %arg6[%c0_10, %c0_11], %36 {strides = array<i32>} : memref<3x32xf32, #tpu.memory_space<vmem>>, vector<3x32xf32>,
    return
  }
  func.func @transform_0(%arg0: i32, %arg1: i32, %arg2: i32) -> (i32, i32, i32) {
    %c0_i32 = arith.constant 0 : i32
    return %arg0, %arg2, %arg1 : i32, i32, i32
  }
  func.func @transform_1(%arg0: i32, %arg1: i32, %arg2: i32) -> (i32, i32) {
    %c0_i32 = arith.constant 0 : i32
    %c0_i32_0 = arith.constant 0 : i32
    return %c0_i32, %arg1 : i32, i32
  }
  func.func @transform_2(%arg0: i32, %arg1: i32, %arg2: i32) -> (i32, i32, i32) {
    %c0_i32 = arith.constant 0 : i32
    return %arg0, %arg2, %arg1 : i32, i32, i32
  }
}

module attributes {stable_mosaic.version = 11 : i64} {
  func.func @kernel(%arg0: i32, %arg1: i32, %arg2: i32, %arg3: memref<1x8x32xf32, #tpu.memory_space<vmem>>, %arg4: memref<32x96xf32, #tpu.memory_space<vmem>>, %arg5: memref<1x32xf32, #tpu.memory_space<vmem>>, %arg6: memref<1x8x16xf32, #tpu.memory_space<vmem>>, %arg7: memref<1x8x16xf32, #tpu.memory_space<vmem>>, %arg8: memref<1x8x32xf32, #tpu.memory_space<vmem>>, %arg9: memref<1x8x32xf32, #tpu.memory_space<vmem>>, %arg10: memref<8x96xf32, #tpu.memory_space<vmem>>) attributes {dimension_semantics = [#tpu.dimension_semantics<parallel>, #tpu.dimension_semantics<parallel>, #tpu.dimension_semantics<arbitrary>], iteration_bounds = array<i64: 2, 1, 1>, scalar_prefetch = 0 : i64, scratch_operands = 1 : i64, tpu.core_type = #tpu.core_type<tc>, window_params = [{transform_indices = @transform_0, window_bounds = array<i64: 1, 8, 32>}, {transform_indices = @transform_1, window_bounds = array<i64: 32, 96>}, {pipeline_mode = #tpu.pipeline_mode<synchronous>, transform_indices = @transform_2, window_bounds = array<i64: 1, 32>}, {transform_indices = @transform_3, window_bounds = array<i64: 1, 8, 16>}, {transform_indices = @transform_4, window_bounds = array<i64: 1, 8, 16>}, {transform_indices = @transform_5, window_bounds = array<i64: 1, 8, 32>}, {transform_indices = @transform_6, window_bounds = array<i64: 1, 8, 32>}]} {
    %c0_i32 = arith.constant 0 : i32
    %0 = arith.cmpi eq, %arg2, %c0_i32 : i32
    %1 = arith.extui %0 : i1 to i32
    %c0_i32_0 = arith.constant 0 : i32
    %2 = arith.cmpi ne, %1, %c0_i32_0 : i32
    scf.if %2 {
      %cst_11 = arith.constant 0.000000e+00 : f32
      %13 = vector.broadcast %cst_11 : f32 to vector<8x96xf32>
      %c0_12 = arith.constant 0 : index
      %c0_13 = arith.constant 0 : index
      %14 = vector.load %arg10[%c0_12, %c0_13] : memref<8x96xf32, #tpu.memory_space<vmem>>, vector<8x96xf32>
      tpu.vector_store %arg10[%c0_12, %c0_13], %13 {strides = array<i32>} : memref<8x96xf32, #tpu.memory_space<vmem>>, vector<8x96xf32>,
    } else {
    }
    %c0 = arith.constant 0 : index
    %c0_1 = arith.constant 0 : index
    %3 = vector.load %arg10[%c0, %c0_1] : memref<8x96xf32, #tpu.memory_space<vmem>>, vector<8x96xf32>
    %c0_2 = arith.constant 0 : index
    %c0_3 = arith.constant 0 : index
    %c0_4 = arith.constant 0 : index
    %4 = vector.load %arg3[%c0_2, %c0_3, %c0_4] : memref<1x8x32xf32, #tpu.memory_space<vmem>>, vector<1x8x32xf32>
    %5 = vector.shape_cast %4 : vector<1x8x32xf32> to vector<8x32xf32>
    %c0_5 = arith.constant 0 : index
    %c0_6 = arith.constant 0 : index
    %6 = vector.load %arg4[%c0_5, %c0_6] : memref<32x96xf32, #tpu.memory_space<vmem>>, vector<32x96xf32>
    %cst = arith.constant dense<0.000000e+00> : vector<8x96xf32>
    %7 = tpu.matmul %5, %6, %cst {dimension_numbers = #tpu.dot_dimension_numbers<[1], [0], [0], [1], [0, 0, 1, 1], [], []>} : vector<8x32xf32>, vector<32x96xf32>, vector<8x96xf32> -> vector<8x96xf32>
    %8 = arith.addf %3, %7 : vector<8x96xf32>
    %c0_7 = arith.constant 0 : index
    %c0_8 = arith.constant 0 : index
    %9 = vector.load %arg10[%c0_7, %c0_8] : memref<8x96xf32, #tpu.memory_space<vmem>>, vector<8x96xf32>
    tpu.vector_store %arg10[%c0_7, %c0_8], %8 {strides = array<i32>} : memref<8x96xf32, #tpu.memory_space<vmem>>, vector<8x96xf32>,
    %c0_i32_9 = arith.constant 0 : i32
    %10 = arith.cmpi eq, %arg2, %c0_i32_9 : i32
    %11 = arith.extui %10 : i1 to i32
    %c0_i32_10 = arith.constant 0 : i32
    %12 = arith.cmpi ne, %11, %c0_i32_10 : i32
    scf.if %12 {
      %c0_11 = arith.constant 0 : index
      %c0_12 = arith.constant 0 : index
      %13 = vector.load %arg10[%c0_11, %c0_12] : memref<8x96xf32, #tpu.memory_space<vmem>>, vector<8x96xf32>
      %14 = vector.extract_strided_slice %13 {offsets = [0, 0], sizes = [8, 16], strides = [1, 1]} : vector<8x96xf32> to vector<8x16xf32>
      %c0_13 = arith.constant 0 : index
      %c0_14 = arith.constant 0 : index
      %c0_15 = arith.constant 0 : index
      %15 = vector.load %arg6[%c0_13, %c0_14, %c0_15] : memref<1x8x16xf32, #tpu.memory_space<vmem>>, vector<1x8x16xf32>
      %16 = vector.shape_cast %15 : vector<1x8x16xf32> to vector<8x16xf32>
      %17 = vector.shape_cast %14 : vector<8x16xf32> to vector<1x8x16xf32>
      tpu.vector_store %arg6[%c0_13, %c0_14, %c0_15], %17 {strides = array<i32>} : memref<1x8x16xf32, #tpu.memory_space<vmem>>, vector<1x8x16xf32>,
      %18 = vector.extract_strided_slice %13 {offsets = [0, 16], sizes = [8, 16], strides = [1, 1]} : vector<8x96xf32> to vector<8x16xf32>
      %c0_16 = arith.constant 0 : index
      %c0_17 = arith.constant 0 : index
      %c0_18 = arith.constant 0 : index
      %19 = vector.load %arg7[%c0_16, %c0_17, %c0_18] : memref<1x8x16xf32, #tpu.memory_space<vmem>>, vector<1x8x16xf32>
      %20 = vector.shape_cast %19 : vector<1x8x16xf32> to vector<8x16xf32>
      %21 = vector.shape_cast %18 : vector<8x16xf32> to vector<1x8x16xf32>
      tpu.vector_store %arg7[%c0_16, %c0_17, %c0_18], %21 {strides = array<i32>} : memref<1x8x16xf32, #tpu.memory_space<vmem>>, vector<1x8x16xf32>,
      %22 = vector.extract_strided_slice %13 {offsets = [0, 32], sizes = [8, 32], strides = [1, 1]} : vector<8x96xf32> to vector<8x32xf32>
      %c0_19 = arith.constant 0 : index
      %c0_20 = arith.constant 0 : index
      %c0_21 = arith.constant 0 : index
      %23 = vector.load %arg8[%c0_19, %c0_20, %c0_21] : memref<1x8x32xf32, #tpu.memory_space<vmem>>, vector<1x8x32xf32>
      %24 = vector.shape_cast %23 : vector<1x8x32xf32> to vector<8x32xf32>
      %25 = vector.shape_cast %22 : vector<8x32xf32> to vector<1x8x32xf32>
      tpu.vector_store %arg8[%c0_19, %c0_20, %c0_21], %25 {strides = array<i32>} : memref<1x8x32xf32, #tpu.memory_space<vmem>>, vector<1x8x32xf32>,
      %26 = vector.extract_strided_slice %13 {offsets = [0, 64], sizes = [8, 32], strides = [1, 1]} : vector<8x96xf32> to vector<8x32xf32>
      %c0_22 = arith.constant 0 : index
      %c0_23 = arith.constant 0 : index
      %27 = vector.load %arg5[%c0_22, %c0_23] : memref<1x32xf32, #tpu.memory_space<vmem>>, vector<1x32xf32>
      %28 = vector.broadcast %27 : vector<1x32xf32> to vector<8x32xf32>
      %29 = arith.addf %26, %28 : vector<8x32xf32>
      %c0_24 = arith.constant 0 : index
      %c0_25 = arith.constant 0 : index
      %c0_26 = arith.constant 0 : index
      %30 = vector.load %arg9[%c0_24, %c0_25, %c0_26] : memref<1x8x32xf32, #tpu.memory_space<vmem>>, vector<1x8x32xf32>
      %31 = vector.shape_cast %30 : vector<1x8x32xf32> to vector<8x32xf32>
      %32 = vector.shape_cast %29 : vector<8x32xf32> to vector<1x8x32xf32>
      tpu.vector_store %arg9[%c0_24, %c0_25, %c0_26], %32 {strides = array<i32>} : memref<1x8x32xf32, #tpu.memory_space<vmem>>, vector<1x8x32xf32>,
    } else {
    }
    return
  }
  func.func @transform_0(%arg0: i32, %arg1: i32, %arg2: i32) -> (i32, i32, i32) {
    %c0_i32 = arith.constant 0 : i32
    return %arg0, %arg1, %arg2 : i32, i32, i32
  }
  func.func @transform_1(%arg0: i32, %arg1: i32, %arg2: i32) -> (i32, i32) {
    %c0_i32 = arith.constant 0 : i32
    %c0_i32_0 = arith.constant 0 : i32
    return %arg2, %c0_i32 : i32, i32
  }
  func.func @transform_2(%arg0: i32, %arg1: i32, %arg2: i32) -> (i32, i32) {
    %c0_i32 = arith.constant 0 : i32
    %c0_i32_0 = arith.constant 0 : i32
    %c0_i32_1 = arith.constant 0 : i32
    return %c0_i32, %c0_i32_0 : i32, i32
  }
  func.func @transform_3(%arg0: i32, %arg1: i32, %arg2: i32) -> (i32, i32, i32) {
    %c0_i32 = arith.constant 0 : i32
    %c0_i32_0 = arith.constant 0 : i32
    return %arg0, %arg1, %c0_i32 : i32, i32, i32
  }
  func.func @transform_4(%arg0: i32, %arg1: i32, %arg2: i32) -> (i32, i32, i32) {
    %c0_i32 = arith.constant 0 : i32
    %c0_i32_0 = arith.constant 0 : i32
    return %arg0, %arg1, %c0_i32 : i32, i32, i32
  }
  func.func @transform_5(%arg0: i32, %arg1: i32, %arg2: i32) -> (i32, i32, i32) {
    %c0_i32 = arith.constant 0 : i32
    %c0_i32_0 = arith.constant 0 : i32
    return %arg0, %arg1, %c0_i32 : i32, i32, i32
  }
  func.func @transform_6(%arg0: i32, %arg1: i32, %arg2: i32) -> (i32, i32, i32) {
    %c0_i32 = arith.constant 0 : i32
    %c0_i32_0 = arith.constant 0 : i32
    return %arg0, %arg1, %c0_i32 : i32, i32, i32
  }
}

module attributes {stable_mosaic.version = 11 : i64} {
  func.func @kernel(%arg0: i32, %arg1: i32, %arg2: memref<1x8x16xf32, #tpu.memory_space<vmem>>, %arg3: memref<1x8x16xf32, #tpu.memory_space<vmem>>, %arg4: memref<1x8x32xf32, #tpu.memory_space<vmem>>, %arg5: memref<1x16xf32, #tpu.memory_space<vmem>>, %arg6: memref<1x8x32xf32, #tpu.memory_space<vmem>>, %arg7: memref<1x2x8x16xf32, #tpu.memory_space<vmem>>, %arg8: memref<2x8x16xf32, #tpu.memory_space<vmem>>) attributes {dimension_semantics = [#tpu.dimension_semantics<parallel>, #tpu.dimension_semantics<arbitrary>], iteration_bounds = array<i64: 2, 1>, scalar_prefetch = 0 : i64, scratch_operands = 1 : i64, tpu.core_type = #tpu.core_type<tc>, window_params = [{transform_indices = @transform_0, window_bounds = array<i64: 1, 8, 16>}, {transform_indices = @transform_1, window_bounds = array<i64: 1, 8, 16>}, {transform_indices = @transform_2, window_bounds = array<i64: 1, 8, 32>}, {pipeline_mode = #tpu.pipeline_mode<synchronous>, transform_indices = @transform_3, window_bounds = array<i64: 1, 16>}, {transform_indices = @transform_4, window_bounds = array<i64: 1, 8, 32>}, {transform_indices = @transform_5, window_bounds = array<i64: 1, 2, 8, 16>}]} {
    %c0_i32 = arith.constant 0 : i32
    %0 = arith.cmpi eq, %arg1, %c0_i32 : i32
    %1 = arith.extui %0 : i1 to i32
    %c0_i32_0 = arith.constant 0 : i32
    %2 = arith.cmpi ne, %1, %c0_i32_0 : i32
    scf.if %2 {
      %cst_61 = arith.constant 0.000000e+00 : f32
      %165 = vector.broadcast %cst_61 : f32 to vector<2x8x16xf32>
      %c0_62 = arith.constant 0 : index
      %c0_63 = arith.constant 0 : index
      %c0_64 = arith.constant 0 : index
      %166 = vector.load %arg8[%c0_62, %c0_63, %c0_64] : memref<2x8x16xf32, #tpu.memory_space<vmem>>, vector<2x8x16xf32>
      tpu.vector_store %arg8[%c0_62, %c0_63, %c0_64], %165 {strides = array<i32>} : memref<2x8x16xf32, #tpu.memory_space<vmem>>, vector<2x8x16xf32>,
    } else {
    }
    %c0 = arith.constant 0 : index
    %c0_1 = arith.constant 0 : index
    %c0_2 = arith.constant 0 : index
    %3 = vector.load %arg2[%c0, %c0_1, %c0_2] : memref<1x8x16xf32, #tpu.memory_space<vmem>>, vector<1x8x16xf32>
    %4 = vector.shape_cast %3 : vector<1x8x16xf32> to vector<8x16xf32>
    %c0_3 = arith.constant 0 : index
    %c0_4 = arith.constant 0 : index
    %c0_5 = arith.constant 0 : index
    %5 = vector.load %arg3[%c0_3, %c0_4, %c0_5] : memref<1x8x16xf32, #tpu.memory_space<vmem>>, vector<1x8x16xf32>
    %6 = vector.shape_cast %5 : vector<1x8x16xf32> to vector<8x16xf32>
    %c0_6 = arith.constant 0 : index
    %c0_7 = arith.constant 0 : index
    %c0_8 = arith.constant 0 : index
    %7 = vector.load %arg4[%c0_6, %c0_7, %c0_8] : memref<1x8x32xf32, #tpu.memory_space<vmem>>, vector<1x8x32xf32>
    %8 = vector.shape_cast %7 : vector<1x8x32xf32> to vector<8x32xf32>
    %c0_9 = arith.constant 0 : index
    %c0_10 = arith.constant 0 : index
    %9 = vector.load %arg5[%c0_9, %c0_10] : memref<1x16xf32, #tpu.memory_space<vmem>>, vector<1x16xf32>
    %cst = arith.constant 0.000000e+00 : f32
    %10 = vector.broadcast %cst : f32 to vector<8x16xf32>
    %11 = arith.subf %10, %6 : vector<8x16xf32>
    %cst_11 = arith.constant 0.000000e+00 : f32
    %12 = vector.broadcast %cst_11 : f32 to vector<8x16xf32>
    %13 = arith.maximumf %11, %12 : vector<8x16xf32>
    %14 = vector.broadcast %cst_11 : f32 to vector<8x16xf32>
    %15 = arith.subf %11, %14 : vector<8x16xf32>
    %16 = arith.cmpf one, %15, %15 : vector<8x16xf32>
    %17 = vector.broadcast %cst_11 : f32 to vector<8x16xf32>
    %18 = arith.addf %11, %17 : vector<8x16xf32>
    %19 = math.absf %15 : vector<8x16xf32>
    %cst_12 = arith.constant 0.000000e+00 : f32
    %20 = vector.broadcast %cst_12 : f32 to vector<8x16xf32>
    %21 = arith.subf %20, %19 : vector<8x16xf32>
    %22 = math.exp %21 : vector<8x16xf32>
    %23 = math.log1p %22 : vector<8x16xf32>
    %24 = arith.addf %13, %23 : vector<8x16xf32>
    %25 = arith.select %16, %18, %24 : vector<8x16xi1>, vector<8x16xf32>
    %cst_13 = arith.constant 0.000000e+00 : f32
    %26 = vector.broadcast %cst_13 : f32 to vector<8x16xf32>
    %27 = arith.subf %26, %25 : vector<8x16xf32>
    %cst_14 = arith.constant 6.250000e-02 : f32
    %28 = vector.broadcast %cst_14 : f32 to vector<8x16xf32>
    %29 = arith.mulf %27, %28 : vector<8x16xf32>
    %30 = math.exp %29 : vector<8x16xf32>
    %cst_15 = arith.constant 1.000000e+00 : f32
    %31 = vector.broadcast %cst_15 : f32 to vector<8x16xf32>
    %32 = arith.subf %31, %30 : vector<8x16xf32>
    %33 = arith.mulf %4, %32 : vector<8x16xf32>
    %34 = vector.broadcast %9 : vector<1x16xf32> to vector<8x16xf32>
    %35 = arith.mulf %33, %34 : vector<8x16xf32>
    %36 = tpu.iota {dimensions = array<i32: 0>} : vector<8x8xi32>
    %37 = tpu.iota {dimensions = array<i32: 1>} : vector<8x8xi32>
    %38 = arith.cmpi sge, %36, %37 : vector<8x8xi32>
    %cst_16 = arith.constant 1.000000e+00 : f32
    %cst_17 = arith.constant 0.000000e+00 : f32
    %39 = vector.broadcast %cst_16 : f32 to vector<8x8xf32>
    %40 = vector.broadcast %cst_17 : f32 to vector<8x8xf32>
    %41 = arith.select %38, %39, %40 : vector<8x8xi1>, vector<8x8xf32>
    %cst_18 = arith.constant dense<0.000000e+00> : vector<8x16xf32>
    %42 = tpu.matmul %41, %29, %cst_18 {dimension_numbers = #tpu.dot_dimension_numbers<[1], [0], [0], [1], [0, 0, 1, 1], [], []>} : vector<8x8xf32>, vector<8x16xf32>, vector<8x16xf32> -> vector<8x16xf32>
    %43 = vector.extract_strided_slice %42 {offsets = [7, 0], sizes = [1, 16], strides = [1, 1]} : vector<8x16xf32> to vector<1x16xf32>
    %44 = math.exp %42 : vector<8x16xf32>
    %45 = arith.mulf %4, %44 : vector<8x16xf32>
    %cst_19 = arith.constant 0.353553385 : f32
    %46 = vector.broadcast %cst_19 : f32 to vector<8x16xf32>
    %47 = arith.mulf %45, %46 : vector<8x16xf32>
    %cst_20 = arith.constant 0.000000e+00 : f32
    %48 = vector.broadcast %cst_20 : f32 to vector<8x16xf32>
    %49 = arith.subf %48, %42 : vector<8x16xf32>
    %50 = math.exp %49 : vector<8x16xf32>
    %51 = arith.mulf %32, %50 : vector<8x16xf32>
    %52 = vector.broadcast %43 : vector<1x16xf32> to vector<8x16xf32>
    %53 = arith.subf %52, %42 : vector<8x16xf32>
    %54 = math.exp %53 : vector<8x16xf32>
    %55 = arith.mulf %32, %54 : vector<8x16xf32>
    %56 = math.exp %43 : vector<1x16xf32>
    %57 = tpu.transpose %56, [1, 0] : vector<1x16xf32> -> vector<16x1xf32>
    %c0_21 = arith.constant 0 : index
    %c0_22 = arith.constant 0 : index
    %c0_23 = arith.constant 0 : index
    %58 = vector.load %arg8[%c0_21, %c0_22, %c0_23] : memref<2x8x16xf32, #tpu.memory_space<vmem>>, vector<1x8x16xf32>
    %59 = vector.shape_cast %58 : vector<1x8x16xf32> to vector<8x16xf32>
    %60 = vector.extract_strided_slice %8 {offsets = [0, 0], sizes = [8, 16], strides = [1, 1]} : vector<8x32xf32> to vector<8x16xf32>
    %61 = vector.extract_strided_slice %47 {offsets = [0, 0], sizes = [8, 8], strides = [1, 1]} : vector<8x16xf32> to vector<8x8xf32>
    %62 = vector.extract_strided_slice %51 {offsets = [0, 0], sizes = [8, 8], strides = [1, 1]} : vector<8x16xf32> to vector<8x8xf32>
    %63 = vector.extract_strided_slice %55 {offsets = [0, 0], sizes = [8, 8], strides = [1, 1]} : vector<8x16xf32> to vector<8x8xf32>
    %cst_24 = arith.constant dense<0.000000e+00> : vector<8x16xf32>
    %64 = tpu.matmul %61, %59, %cst_24 {dimension_numbers = #tpu.dot_dimension_numbers<[1], [0], [0], [1], [0, 0, 1, 1], [], []>} : vector<8x8xf32>, vector<8x16xf32>, vector<8x16xf32> -> vector<8x16xf32>
    %cst_25 = arith.constant dense<0.000000e+00> : vector<8x8xf32>
    %65 = tpu.matmul %61, %62, %cst_25 {dimension_numbers = #tpu.dot_dimension_numbers<[1], [1], [0], [0], [0, 0, 1, 0], [], []>} : vector<8x8xf32>, vector<8x8xf32>, vector<8x8xf32> -> vector<8x8xf32>
    %cst_26 = arith.constant 0.000000e+00 : f32
    %66 = vector.broadcast %cst_26 : f32 to vector<8x8xf32>
    %67 = arith.select %38, %65, %66 : vector<8x8xi1>, vector<8x8xf32>
    %cst_27 = arith.constant dense<0.000000e+00> : vector<8x16xf32>
    %68 = tpu.matmul %67, %60, %cst_27 {dimension_numbers = #tpu.dot_dimension_numbers<[1], [0], [0], [1], [0, 0, 1, 1], [], []>} : vector<8x8xf32>, vector<8x16xf32>, vector<8x16xf32> -> vector<8x16xf32>
    %69 = arith.addf %64, %68 : vector<8x16xf32>
    %70 = vector.extract_strided_slice %57 {offsets = [0, 0], sizes = [8, 1], strides = [1, 1]} : vector<16x1xf32> to vector<8x1xf32>
    %71 = vector.broadcast %70 : vector<8x1xf32> to vector<8x16xf32>
    %72 = arith.mulf %59, %71 : vector<8x16xf32>
    %cst_28 = arith.constant dense<0.000000e+00> : vector<8x16xf32>
    %73 = tpu.matmul %63, %60, %cst_28 {dimension_numbers = #tpu.dot_dimension_numbers<[0], [0], [1], [1], [0, 1, 1, 1], [], []>} : vector<8x8xf32>, vector<8x16xf32>, vector<8x16xf32> -> vector<8x16xf32>
    %74 = arith.addf %72, %73 : vector<8x16xf32>
    %c0_29 = arith.constant 0 : index
    %c0_30 = arith.constant 0 : index
    %c0_31 = arith.constant 0 : index
    %75 = vector.load %arg8[%c0_29, %c0_30, %c0_31] : memref<2x8x16xf32, #tpu.memory_space<vmem>>, vector<1x8x16xf32>
    %76 = vector.shape_cast %75 : vector<1x8x16xf32> to vector<8x16xf32>
    %77 = vector.shape_cast %74 : vector<8x16xf32> to vector<1x8x16xf32>
    tpu.vector_store %arg8[%c0_29, %c0_30, %c0_31], %77 {strides = array<i32>} : memref<2x8x16xf32, #tpu.memory_space<vmem>>, vector<1x8x16xf32>,
    %78 = vector.extract_strided_slice %35 {offsets = [0, 0], sizes = [8, 8], strides = [1, 1]} : vector<8x16xf32> to vector<8x8xf32>
    %cst_32 = arith.constant dense<0.000000e+00> : vector<8xf32>
    %79 = vector.multi_reduction <add>, %78, %cst_32 [1] : vector<8x8xf32> to vector<8xf32>
    %80 = vector.shape_cast %79 : vector<8xf32> to vector<8x1xf32>
    %81 = vector.extract_strided_slice %8 {offsets = [0, 0], sizes = [8, 16], strides = [1, 1]} : vector<8x32xf32> to vector<8x16xf32>
    %82 = vector.broadcast %80 : vector<8x1xf32> to vector<8x16xf32>
    %83 = arith.mulf %82, %81 : vector<8x16xf32>
    %84 = arith.negf %83 : vector<8x16xf32>
    %85 = math.exp %84 : vector<8x16xf32>
    %cst_33 = arith.constant 1.000000e+00 : f32
    %86 = vector.broadcast %cst_33 : f32 to vector<8x16xf32>
    %87 = arith.addf %86, %85 : vector<8x16xf32>
    %88 = arith.divf %86, %87 : vector<8x16xf32>
    %89 = arith.addf %69, %88 : vector<8x16xf32>
    %cst_34 = arith.constant dense<0.000000e+00> : vector<8xf32>
    %90 = vector.multi_reduction <add>, %89, %cst_34 [1] : vector<8x16xf32> to vector<8xf32>
    %91 = vector.shape_cast %90 : vector<8xf32> to vector<8x1xf32>
    %cst_35 = arith.constant 1.600000e+01 : f32
    %92 = vector.broadcast %cst_35 : f32 to vector<8x1xf32>
    %93 = arith.divf %91, %92 : vector<8x1xf32>
    %94 = vector.broadcast %93 : vector<8x1xf32> to vector<8x16xf32>
    %95 = arith.subf %89, %94 : vector<8x16xf32>
    %96 = arith.mulf %95, %95 : vector<8x16xf32>
    %cst_36 = arith.constant dense<0.000000e+00> : vector<8xf32>
    %97 = vector.multi_reduction <add>, %96, %cst_36 [1] : vector<8x16xf32> to vector<8xf32>
    %98 = vector.shape_cast %97 : vector<8xf32> to vector<8x1xf32>
    %cst_37 = arith.constant 1.600000e+01 : f32
    %99 = vector.broadcast %cst_37 : f32 to vector<8x1xf32>
    %100 = arith.divf %98, %99 : vector<8x1xf32>
    %101 = vector.broadcast %93 : vector<8x1xf32> to vector<8x16xf32>
    %102 = arith.subf %89, %101 : vector<8x16xf32>
    %cst_38 = arith.constant 9.99999974E-6 : f32
    %103 = vector.broadcast %cst_38 : f32 to vector<8x1xf32>
    %104 = arith.addf %100, %103 : vector<8x1xf32>
    %105 = math.rsqrt %104 : vector<8x1xf32>
    %106 = vector.broadcast %105 : vector<8x1xf32> to vector<8x16xf32>
    %107 = arith.mulf %102, %106 : vector<8x16xf32>
    %c1 = arith.constant 1 : index
    %c0_39 = arith.constant 0 : index
    %c0_40 = arith.constant 0 : index
    %108 = vector.load %arg8[%c1, %c0_39, %c0_40] : memref<2x8x16xf32, #tpu.memory_space<vmem>>, vector<1x8x16xf32>
    %109 = vector.shape_cast %108 : vector<1x8x16xf32> to vector<8x16xf32>
    %110 = vector.extract_strided_slice %8 {offsets = [0, 16], sizes = [8, 16], strides = [1, 1]} : vector<8x32xf32> to vector<8x16xf32>
    %111 = vector.extract_strided_slice %47 {offsets = [0, 8], sizes = [8, 8], strides = [1, 1]} : vector<8x16xf32> to vector<8x8xf32>
    %112 = vector.extract_strided_slice %51 {offsets = [0, 8], sizes = [8, 8], strides = [1, 1]} : vector<8x16xf32> to vector<8x8xf32>
    %113 = vector.extract_strided_slice %55 {offsets = [0, 8], sizes = [8, 8], strides = [1, 1]} : vector<8x16xf32> to vector<8x8xf32>
    %cst_41 = arith.constant dense<0.000000e+00> : vector<8x16xf32>
    %114 = tpu.matmul %111, %109, %cst_41 {dimension_numbers = #tpu.dot_dimension_numbers<[1], [0], [0], [1], [0, 0, 1, 1], [], []>} : vector<8x8xf32>, vector<8x16xf32>, vector<8x16xf32> -> vector<8x16xf32>
    %cst_42 = arith.constant dense<0.000000e+00> : vector<8x8xf32>
    %115 = tpu.matmul %111, %112, %cst_42 {dimension_numbers = #tpu.dot_dimension_numbers<[1], [1], [0], [0], [0, 0, 1, 0], [], []>} : vector<8x8xf32>, vector<8x8xf32>, vector<8x8xf32> -> vector<8x8xf32>
    %cst_43 = arith.constant 0.000000e+00 : f32
    %116 = vector.broadcast %cst_43 : f32 to vector<8x8xf32>
    %117 = arith.select %38, %115, %116 : vector<8x8xi1>, vector<8x8xf32>
    %cst_44 = arith.constant dense<0.000000e+00> : vector<8x16xf32>
    %118 = tpu.matmul %117, %110, %cst_44 {dimension_numbers = #tpu.dot_dimension_numbers<[1], [0], [0], [1], [0, 0, 1, 1], [], []>} : vector<8x8xf32>, vector<8x16xf32>, vector<8x16xf32> -> vector<8x16xf32>
    %119 = arith.addf %114, %118 : vector<8x16xf32>
    %120 = vector.extract_strided_slice %57 {offsets = [8, 0], sizes = [8, 1], strides = [1, 1]} : vector<16x1xf32> to vector<8x1xf32>
    %121 = vector.broadcast %120 : vector<8x1xf32> to vector<8x16xf32>
    %122 = arith.mulf %109, %121 : vector<8x16xf32>
    %cst_45 = arith.constant dense<0.000000e+00> : vector<8x16xf32>
    %123 = tpu.matmul %113, %110, %cst_45 {dimension_numbers = #tpu.dot_dimension_numbers<[0], [0], [1], [1], [0, 1, 1, 1], [], []>} : vector<8x8xf32>, vector<8x16xf32>, vector<8x16xf32> -> vector<8x16xf32>
    %124 = arith.addf %122, %123 : vector<8x16xf32>
    %c1_46 = arith.constant 1 : index
    %c0_47 = arith.constant 0 : index
    %c0_48 = arith.constant 0 : index
    %125 = vector.load %arg8[%c1_46, %c0_47, %c0_48] : memref<2x8x16xf32, #tpu.memory_space<vmem>>, vector<1x8x16xf32>
    %126 = vector.shape_cast %125 : vector<1x8x16xf32> to vector<8x16xf32>
    %127 = vector.shape_cast %124 : vector<8x16xf32> to vector<1x8x16xf32>
    tpu.vector_store %arg8[%c1_46, %c0_47, %c0_48], %127 {strides = array<i32>} : memref<2x8x16xf32, #tpu.memory_space<vmem>>, vector<1x8x16xf32>,
    %128 = vector.extract_strided_slice %35 {offsets = [0, 8], sizes = [8, 8], strides = [1, 1]} : vector<8x16xf32> to vector<8x8xf32>
    %cst_49 = arith.constant dense<0.000000e+00> : vector<8xf32>
    %129 = vector.multi_reduction <add>, %128, %cst_49 [1] : vector<8x8xf32> to vector<8xf32>
    %130 = vector.shape_cast %129 : vector<8xf32> to vector<8x1xf32>
    %131 = vector.extract_strided_slice %8 {offsets = [0, 16], sizes = [8, 16], strides = [1, 1]} : vector<8x32xf32> to vector<8x16xf32>
    %132 = vector.broadcast %130 : vector<8x1xf32> to vector<8x16xf32>
    %133 = arith.mulf %132, %131 : vector<8x16xf32>
    %134 = arith.negf %133 : vector<8x16xf32>
    %135 = math.exp %134 : vector<8x16xf32>
    %cst_50 = arith.constant 1.000000e+00 : f32
    %136 = vector.broadcast %cst_50 : f32 to vector<8x16xf32>
    %137 = arith.addf %136, %135 : vector<8x16xf32>
    %138 = arith.divf %136, %137 : vector<8x16xf32>
    %139 = arith.addf %119, %138 : vector<8x16xf32>
    %cst_51 = arith.constant dense<0.000000e+00> : vector<8xf32>
    %140 = vector.multi_reduction <add>, %139, %cst_51 [1] : vector<8x16xf32> to vector<8xf32>
    %141 = vector.shape_cast %140 : vector<8xf32> to vector<8x1xf32>
    %cst_52 = arith.constant 1.600000e+01 : f32
    %142 = vector.broadcast %cst_52 : f32 to vector<8x1xf32>
    %143 = arith.divf %141, %142 : vector<8x1xf32>
    %144 = vector.broadcast %143 : vector<8x1xf32> to vector<8x16xf32>
    %145 = arith.subf %139, %144 : vector<8x16xf32>
    %146 = arith.mulf %145, %145 : vector<8x16xf32>
    %cst_53 = arith.constant dense<0.000000e+00> : vector<8xf32>
    %147 = vector.multi_reduction <add>, %146, %cst_53 [1] : vector<8x16xf32> to vector<8xf32>
    %148 = vector.shape_cast %147 : vector<8xf32> to vector<8x1xf32>
    %cst_54 = arith.constant 1.600000e+01 : f32
    %149 = vector.broadcast %cst_54 : f32 to vector<8x1xf32>
    %150 = arith.divf %148, %149 : vector<8x1xf32>
    %151 = vector.broadcast %143 : vector<8x1xf32> to vector<8x16xf32>
    %152 = arith.subf %139, %151 : vector<8x16xf32>
    %cst_55 = arith.constant 9.99999974E-6 : f32
    %153 = vector.broadcast %cst_55 : f32 to vector<8x1xf32>
    %154 = arith.addf %150, %153 : vector<8x1xf32>
    %155 = math.rsqrt %154 : vector<8x1xf32>
    %156 = vector.broadcast %155 : vector<8x1xf32> to vector<8x16xf32>
    %157 = arith.mulf %152, %156 : vector<8x16xf32>
    %158 = tpu.concatenate %107, %157 in 1 : vector<8x16xf32>, vector<8x16xf32> -> vector<8x32xf32>
    %c0_56 = arith.constant 0 : index
    %c0_57 = arith.constant 0 : index
    %c0_58 = arith.constant 0 : index
    %159 = vector.load %arg6[%c0_56, %c0_57, %c0_58] : memref<1x8x32xf32, #tpu.memory_space<vmem>>, vector<1x8x32xf32>
    %160 = vector.shape_cast %159 : vector<1x8x32xf32> to vector<8x32xf32>
    %161 = vector.shape_cast %158 : vector<8x32xf32> to vector<1x8x32xf32>
    tpu.vector_store %arg6[%c0_56, %c0_57, %c0_58], %161 {strides = array<i32>} : memref<1x8x32xf32, #tpu.memory_space<vmem>>, vector<1x8x32xf32>,
    %c0_i32_59 = arith.constant 0 : i32
    %162 = arith.cmpi eq, %arg1, %c0_i32_59 : i32
    %163 = arith.extui %162 : i1 to i32
    %c0_i32_60 = arith.constant 0 : i32
    %164 = arith.cmpi ne, %163, %c0_i32_60 : i32
    scf.if %164 {
      %c0_61 = arith.constant 0 : index
      %c0_62 = arith.constant 0 : index
      %c0_63 = arith.constant 0 : index
      %165 = vector.load %arg8[%c0_61, %c0_62, %c0_63] : memref<2x8x16xf32, #tpu.memory_space<vmem>>, vector<2x8x16xf32>
      %c0_64 = arith.constant 0 : index
      %c0_65 = arith.constant 0 : index
      %c0_66 = arith.constant 0 : index
      %c0_67 = arith.constant 0 : index
      %166 = vector.load %arg7[%c0_64, %c0_65, %c0_66, %c0_67] : memref<1x2x8x16xf32, #tpu.memory_space<vmem>>, vector<1x2x8x16xf32>
      %167 = vector.shape_cast %166 : vector<1x2x8x16xf32> to vector<2x8x16xf32>
      %168 = vector.shape_cast %165 : vector<2x8x16xf32> to vector<1x2x8x16xf32>
      tpu.vector_store %arg7[%c0_64, %c0_65, %c0_66, %c0_67], %168 {strides = array<i32>} : memref<1x2x8x16xf32, #tpu.memory_space<vmem>>, vector<1x2x8x16xf32>,
    } else {
    }
    return
  }
  func.func @transform_0(%arg0: i32, %arg1: i32) -> (i32, i32, i32) {
    %c0_i32 = arith.constant 0 : i32
    %c0_i32_0 = arith.constant 0 : i32
    return %arg0, %arg1, %c0_i32 : i32, i32, i32
  }
  func.func @transform_1(%arg0: i32, %arg1: i32) -> (i32, i32, i32) {
    %c0_i32 = arith.constant 0 : i32
    %c0_i32_0 = arith.constant 0 : i32
    return %arg0, %arg1, %c0_i32 : i32, i32, i32
  }
  func.func @transform_2(%arg0: i32, %arg1: i32) -> (i32, i32, i32) {
    %c0_i32 = arith.constant 0 : i32
    %c0_i32_0 = arith.constant 0 : i32
    return %arg0, %arg1, %c0_i32 : i32, i32, i32
  }
  func.func @transform_3(%arg0: i32, %arg1: i32) -> (i32, i32) {
    %c0_i32 = arith.constant 0 : i32
    %c0_i32_0 = arith.constant 0 : i32
    %c0_i32_1 = arith.constant 0 : i32
    return %c0_i32, %c0_i32_0 : i32, i32
  }
  func.func @transform_4(%arg0: i32, %arg1: i32) -> (i32, i32, i32) {
    %c0_i32 = arith.constant 0 : i32
    %c0_i32_0 = arith.constant 0 : i32
    return %arg0, %arg1, %c0_i32 : i32, i32, i32
  }
  func.func @transform_5(%arg0: i32, %arg1: i32) -> (i32, i32, i32, i32) {
    %c0_i32 = arith.constant 0 : i32
    %c0_i32_0 = arith.constant 0 : i32
    %c0_i32_1 = arith.constant 0 : i32
    %c0_i32_2 = arith.constant 0 : i32
    return %arg0, %c0_i32, %c0_i32_0, %c0_i32_1 : i32, i32, i32, i32
  }
}

module attributes {stable_mosaic.version = 11 : i64} {
  func.func @_gated_outproj_kernel(%arg0: i32, %arg1: i32, %arg2: i32, %arg3: memref<1x8x32xf32, #tpu.memory_space<vmem>>, %arg4: memref<1x8x32xf32, #tpu.memory_space<vmem>>, %arg5: memref<32x32xf32, #tpu.memory_space<vmem>>, %arg6: memref<1x8x32xf32, #tpu.memory_space<vmem>>, %arg7: memref<8x32xf32, #tpu.memory_space<vmem>>) attributes {dimension_semantics = [#tpu.dimension_semantics<parallel>, #tpu.dimension_semantics<parallel>, #tpu.dimension_semantics<arbitrary>], iteration_bounds = array<i64: 2, 1, 1>, scalar_prefetch = 0 : i64, scratch_operands = 1 : i64, tpu.core_type = #tpu.core_type<tc>, window_params = [{transform_indices = @transform_0, window_bounds = array<i64: 1, 8, 32>}, {transform_indices = @transform_1, window_bounds = array<i64: 1, 8, 32>}, {transform_indices = @transform_2, window_bounds = array<i64: 32, 32>}, {transform_indices = @transform_3, window_bounds = array<i64: 1, 8, 32>}]} {
    %c0_i32 = arith.constant 0 : i32
    %0 = arith.cmpi eq, %arg2, %c0_i32 : i32
    %1 = arith.extui %0 : i1 to i32
    %c0_i32_0 = arith.constant 0 : i32
    %2 = arith.cmpi ne, %1, %c0_i32_0 : i32
    scf.if %2 {
      %cst_15 = arith.constant 0.000000e+00 : f32
      %22 = vector.broadcast %cst_15 : f32 to vector<8x32xf32>
      %c0_16 = arith.constant 0 : index
      %c0_17 = arith.constant 0 : index
      %23 = vector.load %arg7[%c0_16, %c0_17] : memref<8x32xf32, #tpu.memory_space<vmem>>, vector<8x32xf32>
      tpu.vector_store %arg7[%c0_16, %c0_17], %22 {strides = array<i32>} : memref<8x32xf32, #tpu.memory_space<vmem>>, vector<8x32xf32>,
    } else {
    }
    %c0 = arith.constant 0 : index
    %c0_1 = arith.constant 0 : index
    %c0_2 = arith.constant 0 : index
    %3 = vector.load %arg3[%c0, %c0_1, %c0_2] : memref<1x8x32xf32, #tpu.memory_space<vmem>>, vector<1x8x32xf32>
    %4 = vector.shape_cast %3 : vector<1x8x32xf32> to vector<8x32xf32>
    %5 = arith.negf %4 : vector<8x32xf32>
    %6 = math.exp %5 : vector<8x32xf32>
    %cst = arith.constant 1.000000e+00 : f32
    %7 = vector.broadcast %cst : f32 to vector<8x32xf32>
    %8 = arith.addf %7, %6 : vector<8x32xf32>
    %9 = arith.divf %7, %8 : vector<8x32xf32>
    %10 = arith.mulf %4, %9 : vector<8x32xf32>
    %c0_3 = arith.constant 0 : index
    %c0_4 = arith.constant 0 : index
    %c0_5 = arith.constant 0 : index
    %11 = vector.load %arg4[%c0_3, %c0_4, %c0_5] : memref<1x8x32xf32, #tpu.memory_space<vmem>>, vector<1x8x32xf32>
    %12 = vector.shape_cast %11 : vector<1x8x32xf32> to vector<8x32xf32>
    %13 = arith.mulf %10, %12 : vector<8x32xf32>
    %c0_6 = arith.constant 0 : index
    %c0_7 = arith.constant 0 : index
    %14 = vector.load %arg7[%c0_6, %c0_7] : memref<8x32xf32, #tpu.memory_space<vmem>>, vector<8x32xf32>
    %c0_8 = arith.constant 0 : index
    %c0_9 = arith.constant 0 : index
    %15 = vector.load %arg5[%c0_8, %c0_9] : memref<32x32xf32, #tpu.memory_space<vmem>>, vector<32x32xf32>
    %cst_10 = arith.constant dense<0.000000e+00> : vector<8x32xf32>
    %16 = tpu.matmul %13, %15, %cst_10 {dimension_numbers = #tpu.dot_dimension_numbers<[1], [0], [0], [1], [0, 0, 1, 1], [], []>} : vector<8x32xf32>, vector<32x32xf32>, vector<8x32xf32> -> vector<8x32xf32>
    %17 = arith.addf %14, %16 : vector<8x32xf32>
    %c0_11 = arith.constant 0 : index
    %c0_12 = arith.constant 0 : index
    %18 = vector.load %arg7[%c0_11, %c0_12] : memref<8x32xf32, #tpu.memory_space<vmem>>, vector<8x32xf32>
    tpu.vector_store %arg7[%c0_11, %c0_12], %17 {strides = array<i32>} : memref<8x32xf32, #tpu.memory_space<vmem>>, vector<8x32xf32>,
    %c0_i32_13 = arith.constant 0 : i32
    %19 = arith.cmpi eq, %arg2, %c0_i32_13 : i32
    %20 = arith.extui %19 : i1 to i32
    %c0_i32_14 = arith.constant 0 : i32
    %21 = arith.cmpi ne, %20, %c0_i32_14 : i32
    scf.if %21 {
      %c0_15 = arith.constant 0 : index
      %c0_16 = arith.constant 0 : index
      %22 = vector.load %arg7[%c0_15, %c0_16] : memref<8x32xf32, #tpu.memory_space<vmem>>, vector<8x32xf32>
      %c0_17 = arith.constant 0 : index
      %c0_18 = arith.constant 0 : index
      %c0_19 = arith.constant 0 : index
      %23 = vector.load %arg6[%c0_17, %c0_18, %c0_19] : memref<1x8x32xf32, #tpu.memory_space<vmem>>, vector<1x8x32xf32>
      %24 = vector.shape_cast %23 : vector<1x8x32xf32> to vector<8x32xf32>
      %25 = vector.shape_cast %22 : vector<8x32xf32> to vector<1x8x32xf32>
      tpu.vector_store %arg6[%c0_17, %c0_18, %c0_19], %25 {strides = array<i32>} : memref<1x8x32xf32, #tpu.memory_space<vmem>>, vector<1x8x32xf32>,
    } else {
    }
    return
  }
  func.func @transform_0(%arg0: i32, %arg1: i32, %arg2: i32) -> (i32, i32, i32) {
    %c0_i32 = arith.constant 0 : i32
    return %arg0, %arg1, %arg2 : i32, i32, i32
  }
  func.func @transform_1(%arg0: i32, %arg1: i32, %arg2: i32) -> (i32, i32, i32) {
    %c0_i32 = arith.constant 0 : i32
    return %arg0, %arg1, %arg2 : i32, i32, i32
  }
  func.func @transform_2(%arg0: i32, %arg1: i32, %arg2: i32) -> (i32, i32) {
    %c0_i32 = arith.constant 0 : i32
    %c0_i32_0 = arith.constant 0 : i32
    return %arg2, %c0_i32 : i32, i32
  }
  func.func @transform_3(%arg0: i32, %arg1: i32, %arg2: i32) -> (i32, i32, i32) {
    %c0_i32 = arith.constant 0 : i32
    %c0_i32_0 = arith.constant 0 : i32
    return %arg0, %arg1, %c0_i32 : i32, i32, i32
  }
}

</mosaic_0001>

<bundles_post_ra>
// kernel: _lambda_.5
= control target key start
LH: loop header
LB: loop body
LE: loop exit
PB: predicated region body
PF: predicated region fallthrough
CT: control target
= control target key end

     0   :  { %12 = vsyncpa [#allocation4], 0  ;;  %s818_s21 = smov 0   ;;  %s820_s22 = smov 0   ;;  %s879_s0 = inlined_call_operand.vmem [shape: f32[2,8,32], index: 0, kind: input, shape index: {}]   ;;  %s880_s1 = inlined_call_operand.hbm [shape: f32[32,96], index: 1, kind: input, shape index: {}]   ;;  %s881_s2 = inlined_call_operand.vmem [shape: f32[1,32], index: 2, kind: input, shape index: {}]   ;;  %s882_s3 = inlined_call_operand.vmem [shape: f32[2,8,16], index: 3, kind: output, shape index: {0}]   ;;  %s883_s4 = inlined_call_operand.vmem [shape: f32[2,8,16], index: 4, kind: output, shape index: {1}]   ;;  %s884_s5 = inlined_call_operand.vmem [shape: f32[2,8,32], index: 5, kind: output, shape index: {2}]   ;;  %s885_s6 = inlined_call_operand.vmem [shape: f32[2,8,32], index: 6, kind: output, shape index: {3}]  }
   0x1   :  { %s822_s23 = smov 0  }
   0x2 LB: > { %s661_s24 = sadd.s32 4294967295, %s774_s23   ;;  %s37_s25 = sadd.s32 1, %s770_s22  ;;  %s774_s23 = sphi %s822_s23, %s18_s23   ;;  %s770_s22 = sphi %s820_s22, %s887_s22   ;;  %s766_s21 = sphi %s818_s21, %s886_s21  }
   0x3   : > { %p39_p0 = scmp.ge.s32.totalorder %s37_s25, 2  ;;  %p663_p1 = scmp.ge.s32.totalorder %s774_s23, 1 }
   0x4   : > { %p231_p2 = scmp.lt.s32.totalorder %s774_s23, 3  ;;  %p684_p4 = scmp.eq.s32.totalorder %s661_s24, 0 }
   0x5   : > { %s889_s25 = smov (%p39_p0, %s37_s25), 0  ;;  %s245_s28 = sshll.u32 %s880_s1, 4  ;;  %s246_s28 = int_to_ptr.hbm [resolvable:$true] %s245_s28 }
   0x6   : > { %p232_p3 = pnand %p663_p1, %p231_p2  ;;  %s776_s29 = smov [#allocation3]  }
   0x7   : > { %s247_s30 = sshll.u32 %s776_s29, 4  ;;  %s777_s7 = smov 128   ;;  %s248_s30 = int_to_ptr.vmem [resolvable:$true] %s247_s30 }
   0x8   : > { %p680_p5 = pneg %p232_p3  ;;  %s778_s8 = smov 8  }
   0x9   : > { %279 = sbr.rel (%p232_p3) target bundleno = 283 (0x11b), region = 32 }
   0xa   : > { %p681_p6 = pnand %p684_p4, %p680_p5 }
   0xc   : > { %683 = dma.hbm_to_vmem [thread:$0]  (!%p681_p6), %s246_s28, 512, %s248_s30, [#allocation4], %s777_s7, %s777_s7, %s778_s8  }
   0xe   : > { %761 = dma.done.wait (%p684_p4), [#allocation4], 512  }
   0xf   : > { %763 = vsyncadd (%p684_p4), [#allocation4], 4294966784  ;;  %p338_p7 = scmp.lt.s32.totalorder %s766_s21, 1  ;;  %vm381_vm0 = vcmask 785408   ;;  %v779_v0 = vmov 0.0   ;;  %v388_v1 = vld [vmem:[#allocation3 + $0x18] sm:$0xff] }
  0x10   : > { %382 = vst.msk [vmem:[#allocation2] sm:$0xff] %vm381_vm0, %v779_v0  ;;  %v387_v2 = vld [vmem:[#allocation3 + $0x10] sm:$0xff]  ;;  %405 = vmatpush.msra.mxu0 %v388_v1  ;;  %v386_v3 = vld [vmem:[#allocation3 + $0x8] sm:$0xff]  ;;  %v717_v4 = vld [vmem:[%s881_s2] ss:$0 sm:$0xff]  ;;  %s780_s15 = smov 64  }
  0x11   : > { %s891_s21 = smov (!%p338_p7, %s766_s21), 1  ;;  %v385_v5 = vld [vmem:[#allocation3] sm:$0xff]  ;;  %434 = vrot.lane.b32.xlu0 %v717_v4, %s780_s15  ;;  %vm389_vm1 = vcmask 261120   ;;  %vm420_vm2 = vcmask 130048   ;;  %s781_s19 = smov 96  }
  0x12   : > { %s841_s9 = sshll.u32 %s891_s21, 3  ;;  %406 = vmatpush.msra.mxu0 %v387_v2  ;;  %s782_s20 = smov 112  }
  0x13   : > { %s347_s12 = scalar_lea.vmem %s879_s0, %s841_s9  ;;  %s355_s18 = scalar_lea.vmem %s882_s3, %s841_s9 }
  0x14   : > { %407 = vmatpush.msra.mxu0 %v386_v3  ;;  %v384_v6 = vld [vmem:[%s347_s12] sm:$0xff]  ;;  %s369_s26 = scalar_lea.vmem %s884_s5, %s841_s9  ;;  %s362_s29 = scalar_lea.vmem %s883_s4, %s841_s9 }
  0x15   : > { %s376_s8 = scalar_lea.vmem %s885_s6, %s841_s9 }
  0x16   : > { %408 = vmatpush.msra.mxu0 %v385_v5 }
  0x17   : > { %673 = vmatmul.msk.f32.vlgmr.msra.gmra.mxu0 %vm389_vm1, %v384_v6  ;;  %v383_v7 = vld [vmem:[#allocation2] sm:$0xff] }
  0x83   : > { %v435_v11 = vpop.permute.xlu0 %434 }
  0x94   : > { %v410_v8 = vpop.f32.mrf.mxu0 }
  0x95   : > { %v413_v9 = vadd.f32 %v410_v8, %v383_v7 }
  0x97   : > { %415 = vst.msk [vmem:[#allocation2] sm:$0xff] %vm381_vm0, %v413_v9 }
  0x9e   : > { %v419_v10 = vld [vmem:[#allocation2] sm:$0xff] }
  0x9f   : > { %427 = vrot.lane.b32.xlu1 %v419_v10, %s781_s19  ;;  %423 = vrot.lane.b32.xlu0 %v419_v10, %s782_s20  ;;  %421 = vst.msk [vmem:[%s355_s18] sm:$0xff] %vm420_vm2, %v419_v10  ;;  %v437_v12 = vadd.f32 %v435_v11, %v419_v10 }
  0xa7   : > { %439 = vrot.lane.b32.xlu1 %v437_v12, %s780_s15 }
 0x111   : > { %v428_v13 = vpop.permute.xlu1 %427  ;;  %v424_v14 = vpop.permute.xlu0 %423 }
 0x112   : > { %430 = vst.msk [vmem:[%s369_s26] sm:$0xff] %vm389_vm1, %v428_v13 }
 0x113   : > { %426 = vst.msk [vmem:[%s362_s29] sm:$0xff] %vm420_vm2, %v424_v14 }
 0x119   : > { %v440_v15 = vpop.permute.xlu1 %439 }
 0x11a   : > { %442 = vst.msk [vmem:[%s376_s8] sm:$0xff] %vm389_vm1, %v440_v15 }
 0x11b PF: > { %s18_s23 = sadd.s32 1, %s774_s23   ;;  %s886_s21 = smov %s770_s22 }
 0x11c   : > { %p15_p8 = scmp.ge.s32.totalorder %s18_s23, 4   ;;  %s887_s22 = smov %s889_s25 }
 0x11e   :  { %17 = sbr.rel (!%p15_p8) target bundleno = 2 (0x2), region = 112 }
 0x123   :  { %528 = vsyncpa [#allocation4], 1 }
 0x124   :  { %530 = vsyncpa [#allocation4 + $0x1], 1 }

// kernel: _lambda_.4
= control target key start
LH: loop header
LB: loop body
LE: loop exit
PB: predicated region body
PF: predicated region fallthrough
CT: control target
= control target key end

     0   :  { %7 = vsyncpa [#allocation4], 0  ;;  %s697_s0 = inlined_call_operand.hbm [shape: f32[2,8,32], index: 0, kind: input, shape index: {}]   ;;  %s698_s1 = inlined_call_operand.vmem [shape: f32[4,32], index: 1, kind: input, shape index: {}]   ;;  %s699_s2 = inlined_call_operand.vmem [shape: f32[2,8,32], index: 2, kind: output, shape index: {}]  }
   0x1   :  { %9 = vsyncpa [#allocation4 + $0x1], 0  ;;  %s604_s9 = smov 0   ;;  %s606_s10 = smov 0  }
   0x2   :  { %s608_s11 = smov 0   ;;  %s610_s12 = smov 0  }
   0x3   :  { %s612_s13 = smov 0   ;;  %s614_s14 = smov 0  }
   0x4 LB: > { %s428_s15 = sadd.s32 4294967295, %s586_s14   ;;  %s34_s16 = sadd.s32 1, %s582_s13  ;;  %s586_s14 = sphi %s614_s14, %s15_s14   ;;  %s582_s13 = sphi %s612_s13, %s706_s13   ;;  %s578_s12 = sphi %s610_s12, %s705_s12   ;;  %s574_s11 = sphi %s608_s11, %s704_s11   ;;  %s570_s10 = sphi %s606_s10, %s703_s10   ;;  %s566_s9 = sphi %s604_s9, %s702_s9  }
   0x5   : > { %p36_p0 = scmp.ge.s32.totalorder %s34_s16, 2  ;;  %s45_s17 = sadd.s32 1, %s574_s11 }
   0x6   : > { %p52_p1 = scmp.ne.s32.totalorder %s574_s11, %s570_s10  ;;  %p53_p2 = scmp.eq.s32.totalorder %s586_s14, 0 }
   0x7   : > { %s708_s16 = smov (%p36_p0, %s34_s16), 0  ;;  %p58_p4 = scmp.ne.s32.totalorder %s570_s10, %s566_s9 }
   0x8   : > { %p640_p3 = por %p53_p2, %p52_p1  ;;  %s38_s19 = ssub.s32 %s582_s13, %s708_s16 }
   0x9   : > { %p59_p5 = scmp.eq.s32.totalorder %s428_s15, 0  ;;  %p43_p6 = scmp.eq.s32.totalorder %s38_s19, 0 }
   0xa   : > { %p448_p8 = scmp.lt.s32.totalorder %s586_s14, 2  ;;  %s145_s22 = sand.u32 1, %s574_s11  }
   0xb   : > { %p647_p7 = por %p59_p5, %p58_p4  ;;  %s434_s23 = sshll.u32 %s582_s13, 3 }
   0xc   : > { %s653_s21 = scalar_select %p43_p6, %s574_s11, %s45_s17  }
   0xd   : > { %s433_s24 = sshll.u32 %s145_s22, 3  ;;  %s155_s27 = scalar_lea.hbm %s697_s0, %s434_s23 }
   0xe   : > { %s157_s28 = sshll.u32 %s155_s27, 4  ;;  %s149_s29 = scalar_lea.vmem [#allocation3], %s433_s24  ;;  %s158_s28 = int_to_ptr.hbm [resolvable:$true] %s157_s28 }
   0xf   : > { %s159_s30 = sshll.u32 %s149_s29, 4  ;;  %p445_p9 = pnand %p448_p8, %p640_p3  ;;  %s160_s30 = int_to_ptr.vmem [resolvable:$true] %s159_s30 }
  0x10   : > { %p435_p10 = scmp.ge.s32.totalorder %s586_s14, 1  ;;  %p164_p11 = scmp.lt.s32.totalorder %s586_s14, 3 }
  0x11   : > { %s146_s3 = scalar_lea.sflag [#allocation4], %s145_s22 }
  0x12   : > { %447 = dma.hbm_to_vmem [thread:$0]  (!%p445_p9), %s158_s28, 128, %s160_s30, %s146_s3  }
  0x13   : > { %p165_p12 = pnand %p435_p10, %p164_p11 }
  0x14   : > { %s170_s4 = sand.u32 (!%p165_p12), 1, %s570_s10  }
  0x15   : > { %168 = sbr.rel (%p165_p12) target bundleno = 79 (0x4f), region = 28  ;;  %s436_s5 = sshll.u32 (!%p165_p12), %s170_s4, 3 }
  0x16   : > { %s171_s6 = scalar_lea.sflag (!%p165_p12), [#allocation4], %s170_s4  ;;  %s174_s7 = scalar_lea.vmem (!%p165_p12), [#allocation3], %s436_s5 }
  0x1a   : > { %561 = dma.done.wait (%p647_p7), %s171_s6, 128  }
  0x1b   : > { %563 = vsyncadd (%p647_p7), %s171_s6, 4294967168  ;;  %vm223_vm0 = vcmask 256000   ;;  %v588_v0 = vmov 0.0   ;;  %v225_v1 = vld [vmem:[%s174_s7] sm:$0xff]  ;;  %vm230_vm1 = vcmask 1042432   ;;  %vm248_vm2 = vcmask 1041408  }
  0x1c   : > { %224 = vst.msk [vmem:[#allocation2] sm:$0x7] %vm223_vm0, %v588_v0  ;;  %v232_v2 = vld [vmem:[%s698_s1] sm:$0xf]  ;;  %v228_v4 = vrot.slane %v225_v1, 5  ;;  %vm261_vm3 = vcmask 1040384  }
  0x1d   : > { %v236_v5 = vperm.slane %v232_v2, 0  ;;  %v243_v6 = vperm.slane %v232_v2, 1  ;;  %v233_v7 = vperm.slane %v232_v2, 3  ;;  %v256_v8 = vperm.slane %v232_v2, 2  ;;  %p209_p13 = scmp.lt.s32.totalorder %s578_s12, 1 }
  0x1e   : > { %vm313_vm4 = vcmask 261125   ;;  %vm309_vm12 = vcmask 261123  }
  0x1f   : > { %v245_v10 = vmul.f32 %v243_v6, %v228_v4  ;;  %v235_v14 = vmul.f32 %v233_v7, %v228_v4  ;;  %v258_v16 = vmul.f32 %v256_v8, %v228_v4  ;;  %s710_s12 = smov (!%p209_p13, %s578_s12), 1 }
  0x20   : > { %s437_s15 = sshll.u32 %s710_s12, 3 }
  0x21   : > { %v250_v15 = vrot.slane %v245_v10, 6  ;;  %v263_v21 = vrot.slane %v258_v16, 7  ;;  %s218_s19 = scalar_lea.vmem %s699_s2, %s437_s15 }
  0x23   : > { %v226_v3 = vld [vmem:[#allocation2] sm:$0x7] }
  0x24   : > { %v231_v9 = vsel %vm230_vm1, %v226_v3, %v228_v4  ;;  %314 = vst.msk [vmem:[#allocation2 - $0x5] sm:$0xe0] %vm313_vm4, %v225_v1 }
  0x25   : > { %v237_v11 = vmul.f32 %v236_v5, %v231_v9  ;;  %v244_v12 = vmul.f32 %v243_v6, %v231_v9  ;;  %v257_v13 = vmul.f32 %v256_v8, %v231_v9  ;;  %v234_v17 = vmul.f32 %v233_v7, %v231_v9 }
  0x27   : > { %v239_v18 = vrot.slane %v237_v11, 5  ;;  %v249_v19 = vrot.slane %v244_v12, 6  ;;  %v262_v20 = vrot.slane %v257_v13, 7 }
  0x29   : > { %v241_v22 = vadd.f32 %v239_v18, %v234_v17  ;;  %v242_v23 = vadd.f32 %v239_v18, %v235_v14  ;;  %v251_v24 = vsel %vm248_vm2, %v249_v19, %v250_v15  ;;  %v264_v27 = vsel %vm261_vm3, %v262_v20, %v263_v21 }
  0x2b   : > { %v254_v25 = vadd.f32 %v249_v19, %v241_v22  ;;  %v255_v26 = vadd.f32 %v251_v24, %v242_v23 }
  0x2d   : > { %v267_v28 = vadd.f32 %v262_v20, %v254_v25  ;;  %v268_v29 = vadd.f32 %v264_v27, %v255_v26 }
  0x2f   : > { %v438_v30 = vmul.f32 -1.442695, %v267_v28  ;;  %v439_v31 = vmul.f32 -1.442695, %v268_v29 }
  0x31   : > { %498 = vpow2.f32 %v438_v30 }
  0x32   : > { %500 = vpow2.f32 %v439_v31 }
  0x37   : > { %v499_v32 = vpop.eup %498 }
  0x38   : > { %v501_v33 = vpop.eup %500  ;;  %v275_v34 = vadd.f32 1.0, %v499_v32 }
  0x39   : > { %v276_v35 = vadd.f32 1.0, %v501_v33 }
  0x3a   : > { %502 = vrcp.f32 %v275_v34  ;;  %v288_v41 = vand.u32 2147483648, %v275_v34  ;;  %v286_v44 = vand.u32 2147483647, %v275_v34  ;;  %vm282_vm7 = vweird.f32 %v275_v34 }
  0x3b   : > { %504 = vrcp.f32 %v276_v35  ;;  %v303_v45 = vand.u32 2147483648, %v276_v35  ;;  %v301_v47 = vand.u32 2147483647, %v276_v35  ;;  %vm297_vm9 = vweird.f32 %v276_v35 }
  0x3c   : > { %v289_v49 = vor.u32 1.1754944e-38, %v288_v41  ;;  %vm287_vm10 = vcmp.eq.f32.partialorder %v286_v44, 8.507059e+37 }
  0x3d   : > { %v304_v52 = vor.u32 1.1754944e-38, %v303_v45  ;;  %vm302_vm13 = vcmp.eq.f32.partialorder %v301_v47, 8.507059e+37 }
  0x40   : > { %v503_v36 = vpop.eup %502 }
  0x41   : > { %v505_v37 = vpop.eup %504  ;;  %v278_v38 = vmul.f32 %v503_v36, %v275_v34  ;;  %vm283_vm5 = vweird.f32 %v503_v36 }
  0x42   : > { %v293_v39 = vmul.f32 %v505_v37, %v276_v35  ;;  %vm298_vm6 = vweird.f32 %v505_v37  ;;  %vm284_vm8 = vmor %vm282_vm7, %vm283_vm5 }
  0x43   : > { %v279_v40 = vsub.f32 1.0, %v278_v38  ;;  %vm299_vm11 = vmor %vm297_vm9, %vm298_vm6 }
  0x44   : > { %v294_v42 = vsub.f32 1.0, %v293_v39 }
  0x45   : > { %v280_v43 = vmul.f32 %v503_v36, %v279_v40 }
  0x46   : > { %v295_v46 = vmul.f32 %v505_v37, %v294_v42 }
  0x47   : > { %v281_v48 = vadd.f32 %v503_v36, %v280_v43 }
  0x48   : > { %v296_v50 = vadd.f32 %v505_v37, %v295_v46 }
  0x49   : > { %v285_v51 = vsel %vm284_vm8, %v503_v36, %v281_v48 }
  0x4a   : > { %v290_v53 = vsel %vm287_vm10, %v289_v49, %v285_v51  ;;  %v300_v54 = vsel %vm299_vm11, %v505_v37, %v296_v50 }
  0x4b   : > { %v307_v55 = vmul.f32 %v290_v53, %v267_v28  ;;  %v305_v56 = vsel %vm302_vm13, %v304_v52, %v300_v54 }
  0x4c   : > { %v308_v57 = vmul.f32 %v305_v56, %v268_v29 }
  0x4d   : > { %310 = vst.msk [vmem:[%s218_s19 - $0x3] sm:$0xf8] %vm309_vm12, %v307_v55 }
  0x4e   : > { %312 = vst.msk [vmem:[%s218_s19 + $0x5] sm:$0x7] %vm223_vm0, %v308_v57 }
  0x4f PF: > { %s15_s14 = sadd.s32 1, %s586_s14   ;;  %s702_s9 = smov %s570_s10 }
  0x50   : > { %p12_p0 = scmp.ge.s32.totalorder %s15_s14, 4   ;;  %s703_s10 = smov %s574_s11 }
  0x51   : > { %s704_s11 = smov %s653_s21  ;;  %s705_s12 = smov %s582_s13 }
  0x52   : > { %s706_s13 = smov %s708_s16  ;;  %14 = sbr.rel (!%p12_p0) target bundleno = 4 (0x4), region = 75 }
  0x57   :  { %346 = vsyncpa [#allocation4], 1 }
  0x58   :  { %348 = vsyncpa [#allocation4 + $0x1], 1 }

// kernel: _lambda_.7
= control target key start
LH: loop header
LB: loop body
LE: loop exit
PB: predicated region body
PF: predicated region fallthrough
CT: control target
= control target key end

     0   :  { %8 = vsyncpa [#allocation4], 0  ;;  %s799_s0 = inlined_call_operand.vmem [shape: f32[2,8,32], index: 0, kind: input, shape index: {}]   ;;  %s800_s1 = inlined_call_operand.vmem [shape: f32[2,8,32], index: 1, kind: input, shape index: {}]   ;;  %s801_s2 = inlined_call_operand.hbm [shape: f32[32,32], index: 2, kind: input, shape index: {}]   ;;  %s802_s3 = inlined_call_operand.hbm [shape: f32[2,8,32], index: 3, kind: output, shape index: {}]  }
   0x1   :  { %9 = vsyncpa [#allocation5], 0 }
   0x2   :  { %11 = vsyncpa [#allocation5 + $0x1], 0  ;;  %s692_s12 = smov 0   ;;  %s694_s13 = smov 0  }
   0x3   :  { %s696_s14 = smov 0   ;;  %s698_s15 = smov 0  }
   0x4   :  { %s700_s16 = smov 0   ;;  %s702_s17 = smov 0  }
   0x5 LB: > { %s465_s18 = sadd.s32 4294967295, %s666_s17   ;;  %s466_s19 = sadd.s32 4294967294, %s666_s17   ;;  %s666_s17 = sphi %s702_s17, %s17_s17   ;;  %s662_s16 = sphi %s700_s16, %s809_s16   ;;  %s658_s15 = sphi %s698_s15, %s808_s15   ;;  %s654_s14 = sphi %s696_s14, %s807_s14   ;;  %s650_s13 = sphi %s694_s13, %s806_s13   ;;  %s646_s12 = sphi %s692_s12, %s805_s12  }
   0x6   : > { %s36_s20 = sadd.s32 1, %s662_s16  ;;  %s131_s21 = sadd.s32 1, %s654_s14 }
   0x7   : > { %p38_p0 = scmp.ge.s32.totalorder %s36_s20, 2  ;;  %p141_p1 = scmp.ne.s32.totalorder %s654_s14, %s650_s13 }
   0x8   : > { %p142_p2 = scmp.eq.s32.totalorder %s465_s18, 1  ;;  %p147_p3 = scmp.ne.s32.totalorder %s650_s13, %s646_s12 }
   0x9   : > { %s811_s20 = smov (%p38_p0, %s36_s20), 0  ;;  %p148_p5 = scmp.eq.s32.totalorder %s466_s19, 1 }
   0xa   : > { %p732_p4 = por %p142_p2, %p141_p1  ;;  %s126_s23 = ssub.s32 %s662_s16, %s811_s20 }
   0xb   : > { %p467_p6 = scmp.ge.s32.totalorder %s666_s17, 1  ;;  %p129_p7 = scmp.eq.s32.totalorder %s126_s23, 0 }
   0xc   : > { %p739_p8 = por %p148_p5, %p147_p3  ;;  %p155_p9 = scmp.lt.s32.totalorder %s666_s17, 3 }
   0xd   : > { %s745_s25 = scalar_select %p129_p7, %s654_s14, %s131_s21  }
   0xe   : > { %p156_p10 = pnand %p467_p6, %p155_p9  ;;  %p495_p11 = scmp.eq.s32.totalorder %s465_s18, 0 }
   0xf   : > { %s169_s28 = sshll.u32 %s801_s2, 4  ;;  %s668_s29 = smov [#allocation3]   ;;  %s170_s28 = int_to_ptr.hbm [resolvable:$true] %s169_s28 }
  0x10   : > { %p487_p12 = pneg %p156_p10  ;;  %s171_s30 = sshll.u32 %s668_s29, 4  ;;  %s172_s30 = int_to_ptr.vmem [resolvable:$true] %s171_s30 }
  0x11   : > { %s669_s4 = smov 128   ;;  %s670_s5 = smov 8  }
  0x12   : > { %p488_p13 = pnand %p495_p11, %p487_p12  ;;  %213 = sbr.rel (%p156_p10) target bundleno = 202 (0xca), region = 32 }
  0x14   : > { %490 = dma.hbm_to_vmem [thread:$0]  (!%p488_p13), %s170_s28, 512, %s172_s30, [#allocation4], %s669_s4, %s669_s4, %s670_s5  }
  0x17   : > { %637 = dma.done.wait (%p495_p11), [#allocation4], 512  }
  0x18   : > { %639 = vsyncadd (%p495_p11), [#allocation4], 4294966784  ;;  %p253_p0 = scmp.lt.s32.totalorder %s658_s15, 1  ;;  %vm278_vm0 = vcmask 261120   ;;  %v671_v0 = vmov 0.0   ;;  %v307_v1 = vld [vmem:[#allocation3 + $0x18] sm:$0xff] }
  0x19   : > { %279 = vst.msk [vmem:[#allocation2] sm:$0xff] %vm278_vm0, %v671_v0  ;;  %v306_v2 = vld [vmem:[#allocation3 + $0x10] sm:$0xff]  ;;  %324 = vmatpush.msra.mxu0 %v307_v1  ;;  %v305_v4 = vld [vmem:[#allocation3 + $0x8] sm:$0xff]  ;;  %v304_v6 = vld [vmem:[#allocation3] sm:$0xff]  ;;  %s250_s21 = sand.u32 1, %s650_s13   ;;  %s478_s26 = sshll.u32 %s658_s15, 3 }
  0x1a   : > { %s254_s6 = scalar_select %p253_p0, %s658_s15, 1 }
  0x1b   : > { %325 = vmatpush.msra.mxu0 %v306_v2  ;;  %s472_s23 = sshll.u32 %s250_s21, 3  ;;  %s351_s29 = scalar_lea.hbm %s802_s3, %s478_s26 }
  0x1c   : > { %s473_s7 = sshll.u32 %s254_s6, 3  ;;  %s252_s30 = scalar_lea.vmem [#allocation6], %s472_s23 }
  0x1d   : > { %s262_s10 = scalar_lea.vmem %s799_s0, %s473_s7  ;;  %326 = vmatpush.msra.mxu0 %v305_v4  ;;  %s272_s19 = scalar_lea.vmem %s800_s1, %s473_s7 }
  0x1e   : > { %v280_v3 = vld [vmem:[%s262_s10] sm:$0xff]  ;;  %s353_s4 = sshll.u32 %s252_s30, 4  ;;  %s355_s5 = sshll.u32 %s351_s29, 4  ;;  %s354_s4 = int_to_ptr.vmem [resolvable:$true] %s353_s4  ;;  %s356_s5 = int_to_ptr.hbm [resolvable:$true] %s355_s5 }
  0x1f   : > { %v475_v5 = vmul.f32 -1.442695, %v280_v3  ;;  %327 = vmatpush.msra.mxu0 %v304_v6  ;;  %v301_v19 = vld [vmem:[%s272_s19] sm:$0xff]  ;;  %s340_s6 = scalar_lea.sflag [#allocation5], %s250_s21  ;;  %s598_s7 = sshra.s32 %s356_s5, 4  ;;  %s599_s7 = int_to_ptr.hbm [resolvable:$true] %s598_s7 }
  0x20   : > { %v303_v22 = vld [vmem:[#allocation2] sm:$0xff]  ;;  %s600_s15 = scalar_lea.hbm %s599_s7, 8  ;;  %s604_s10 = scalar_lea.hbm %s802_s3, 16 }
  0x21   : > { %550 = vpow2.f32 %v475_v5  ;;  %p601_p1 = scmp.ne.s32.totalorder %s599_s7, %s600_s15  ;;  %p605_p5 = scmp.lt.s32.totalorder %s599_s7, %s802_s3 }
  0x22   : > { %p606_p6 = scmp.lt.s32.totalorder %s604_s10, %s600_s15 }
  0x23   : > { %p602_p2 = pnand %p601_p1, %p732_p4 }
  0x24   : > { %p607_p7 = por %p606_p6, %p605_p5 }
  0x25   : > { %p603_p3 = pneg %p602_p2 }
  0x27   : > { %v551_v7 = vpop.eup %550  ;;  %p608_p9 = pnand %p607_p7, %p603_p3 }
  0x28   : > { %v284_v8 = vadd.f32 1.0, %v551_v7 }
  0x2a   : > { %552 = vrcp.f32 %v284_v8  ;;  %v296_v11 = vand.u32 2147483648, %v284_v8  ;;  %vm290_vm1 = vweird.f32 %v284_v8  ;;  %v294_v13 = vand.u32 2147483647, %v284_v8 }
  0x2c   : > { %v297_v15 = vor.u32 1.1754944e-38, %v296_v11  ;;  %vm295_vm4 = vcmp.eq.f32.partialorder %v294_v13, 8.507059e+37 }
  0x30   : > { %v553_v9 = vpop.eup %552 }
  0x31   : > { %v286_v10 = vmul.f32 %v553_v9, %v284_v8  ;;  %vm291_vm2 = vweird.f32 %v553_v9 }
  0x32   : > { %vm292_vm3 = vmor %vm290_vm1, %vm291_vm2 }
  0x33   : > { %v287_v12 = vsub.f32 1.0, %v286_v10 }
  0x35   : > { %v288_v14 = vmul.f32 %v553_v9, %v287_v12 }
  0x37   : > { %v289_v16 = vadd.f32 %v553_v9, %v288_v14 }
  0x39   : > { %v293_v17 = vsel %vm292_vm3, %v553_v9, %v289_v16 }
  0x3a   : > { %v298_v18 = vsel %vm295_vm4, %v297_v15, %v293_v17 }
  0x3b   : > { %v300_v20 = vmul.f32 %v298_v18, %v280_v3 }
  0x3d   : > { %v302_v21 = vmul.f32 %v301_v19, %v300_v20 }
  0x3f   : > { %476 = vmatmul.msk.f32.vlgmr.msra.gmra.mxu0 %vm278_vm0, %v302_v21 }
  0xbc   : > { %v329_v23 = vpop.f32.mrf.mxu0 }
  0xbd   : > { %v332_v24 = vadd.f32 %v329_v23, %v303_v22 }
  0xbf   : > { %333 = vst.msk [vmem:[#allocation2] sm:$0xff] %vm278_vm0, %v332_v24 }
  0xc6   : > { %v337_v25 = vld [vmem:[#allocation2] sm:$0xff] }
  0xc7   : > { %338 = vst.msk [vmem:[%s252_s30] sm:$0xff] %vm278_vm0, %v337_v25 }
  0xc8   : > { %611 = shalt.err (!%p608_p9)
}
  0xc9   : > { %485 = dma.vmem_to_hbm [thread:$0]  (%p732_p4), %s354_s4, 128, %s356_s5, %s340_s6  }
  0xca PF: > { %p497_p10 = scmp.ge.s32.totalorder %s666_s17, 2  ;;  %s367_s19 = sand.u32 1, %s646_s12  }
  0xcb   : > { %s368_s21 = scalar_lea.sflag [#allocation5], %s367_s19 }
  0xcc   : > { %p492_p11 = pnand %p497_p10, %p739_p8 }
  0xce   : > { %p493_p12 = pneg %p492_p11 }
  0xd0   : > { %641 = dma.done.wait (%p493_p12), %s368_s21, 128  }
  0xd1   : > { %643 = vsyncadd (%p493_p12), %s368_s21, 4294967168  ;;  %s17_s17 = sadd.s32 1, %s666_s17   ;;  %s805_s12 = smov %s650_s13 }
  0xd2   : > { %p14_p13 = scmp.ge.s32.totalorder %s17_s17, 4   ;;  %s806_s13 = smov %s654_s14 }
  0xd3   : > { %s807_s14 = smov %s745_s25  ;;  %s808_s15 = smov %s662_s16 }
  0xd4   : > { %s809_s16 = smov %s811_s20  ;;  %16 = sbr.rel (!%p14_p13) target bundleno = 5 (0x5), region = 84 }
  0xd9   :  { %374 = vsyncpa [#allocation4], 1 }
  0xda   :  { %376 = vsyncpa [#allocation4 + $0x1], 1 }
  0xdb   :  { %377 = vsyncpa [#allocation5], 1 }
  0xdc   :  { %379 = vsyncpa [#allocation5 + $0x1], 1 }

// kernel: _lambda_.6
= control target key start
LH: loop header
LB: loop body
LE: loop exit
PB: predicated region body
PF: predicated region fallthrough
CT: control target
= control target key end

     0   :  { %11 = vsyncpa [#allocation4], 0  ;;  %s1439_s0 = inlined_call_operand.vmem [shape: f32[2,8,16], index: 0, kind: input, shape index: {}]   ;;  %s1440_s1 = inlined_call_operand.vmem [shape: f32[2,8,16], index: 1, kind: input, shape index: {}]   ;;  %s1441_s2 = inlined_call_operand.vmem [shape: f32[2,8,32], index: 2, kind: input, shape index: {}]   ;;  %s1442_s3 = inlined_call_operand.vmem [shape: f32[1,16], index: 3, kind: input, shape index: {}]   ;;  %s1443_s4 = inlined_call_operand.vmem [shape: f32[2,8,32], index: 4, kind: output, shape index: {0}]   ;;  %s1444_s5 = inlined_call_operand.hbm [shape: f32[2,2,8,16], index: 5, kind: output, shape index: {1}]  }
   0x1   :  { %13 = vsyncpa [#allocation4 + $0x1], 0  ;;  %s1236_s18 = smov 0   ;;  %s1238_s19 = smov 0  }
   0x2   :  { %s1240_s20 = smov 0   ;;  %s1242_s21 = smov 0  }
   0x3   :  { %s1244_s22 = smov 0   ;;  %s1246_s23 = smov 0  }
   0x4 LB: > { %s997_s24 = sadd.s32 4294967295, %s1196_s23   ;;  %s998_s25 = sadd.s32 4294967294, %s1196_s23   ;;  %s1196_s23 = sphi %s1246_s23, %s19_s23   ;;  %s1192_s22 = sphi %s1244_s22, %s1451_s22   ;;  %s1188_s21 = sphi %s1242_s21, %s1450_s21   ;;  %s1184_s20 = sphi %s1240_s20, %s1449_s20   ;;  %s1180_s19 = sphi %s1238_s19, %s1448_s19   ;;  %s1176_s18 = sphi %s1236_s18, %s1447_s18  }
   0x5   : > { %s31_s26 = sadd.s32 1, %s1192_s22  ;;  %s171_s27 = sadd.s32 1, %s1184_s20 }
   0x6   : > { %p33_p0 = scmp.ge.s32.totalorder %s31_s26, 2  ;;  %p181_p1 = scmp.ne.s32.totalorder %s1184_s20, %s1180_s19 }
   0x7   : > { %p182_p2 = scmp.eq.s32.totalorder %s997_s24, 1  ;;  %p187_p3 = scmp.ne.s32.totalorder %s1180_s19, %s1176_s18 }
   0x8   : > { %s1453_s26 = smov (%p33_p0, %s31_s26), 0  ;;  %p188_p5 = scmp.eq.s32.totalorder %s998_s25, 1 }
   0x9   : > { %p1276_p4 = por %p182_p2, %p181_p1  ;;  %s168_s29 = ssub.s32 %s1192_s22, %s1453_s26 }
   0xa   : > { %p1001_p6 = scmp.ge.s32.totalorder %s1196_s23, 1  ;;  %p169_p7 = scmp.eq.s32.totalorder %s168_s29, 0 }
   0xb   : > { %p1283_p8 = por %p188_p5, %p187_p3  ;;  %p239_p9 = scmp.lt.s32.totalorder %s1196_s23, 3 }
   0xc   : > { %s1289_s6 = scalar_select %p169_p7, %s1184_s20, %s171_s27  }
   0xd   : > { %p240_p10 = pnand %p1001_p6, %p239_p9 }
   0xe   : > { %p290_p11 = scmp.lt.s32.totalorder (!%p240_p10), %s1188_s21, 1  ;;  %s1198_s15 = smov (!%p240_p10), 112  }
   0xf   : > { %243 = sbr.rel (%p240_p10) target bundleno = 987 (0x3db), region = 36  ;;  %s1200_s29 = smov (!%p240_p10), 120  }
  0x10   : > { %s1025_s12 = sshll.u32 (!%p240_p10), %s1188_s21, 4 }
  0x14   : > { %s291_s7 = scalar_select %p290_p11, %s1188_s21, 1  ;;  %vm322_vm0 = vcmask 130048   ;;  %v1199_v6 = vmov 0.0   ;;  %v358_v12 = vlaneseq  ;;  %vm364_vm4 = vcmask 64512   ;;  %v1091_v29 = vld [vmem:[%s1442_s3] ss:$0 sm:$0xff] }
  0x15   : > { %323 = vst.msk [vmem:[#allocation2] sm:$0xff] %vm322_vm0, %v1199_v6 }
  0x16   : > { %s1293_s8 = sshll.u32 %s291_s7, 3  ;;  %324 = vst.msk [vmem:[#allocation2 + $0x8] sm:$0xff] %vm322_vm0, %v1199_v6  ;;  %v1310_v17 = vshrl.u32 %v358_v12, 7  ;;  %v1312_v18 = vand.u32 127, %v358_v12  ;;  %s287_s7 = sand.u32 1, %s1180_s19  }
  0x17   : > { %s303_s11 = scalar_lea.vmem %s1440_s1, %s1293_s8  ;;  %s310_s14 = scalar_lea.vmem %s1441_s2, %s1293_s8 }
  0x18   : > { %v326_v0 = vld [vmem:[%s303_s11] sm:$0xff]  ;;  %vm362_vm3 = vcmp.ge.s32.totalorder %v1310_v17, %v1312_v18  ;;  %s296_s24 = scalar_lea.vmem %s1439_s0, %s1293_s8  ;;  %s1002_s9 = sshll.u32 %s287_s7, 4 }
  0x19   : > { %v329_v1 = vsub.f32 0.0, %v326_v0  ;;  %v1303_v5 = vld [vmem:[%s310_s14] sm:$0xff]  ;;  %v363_v24 = vsel %vm362_vm3, 1.0, %v1199_v6  ;;  %s1384_s10 = scalar_lea.vmem [#allocation3], %s1002_s9  ;;  %s1203_s11 = smov 16  }
  0x1a   : > { %656 = vrot.lane.b32.xlu1 %v1303_v5, %s1198_s15  ;;  %482 = vmatpush.msra.mxu2 %v1303_v5  ;;  %v325_v27 = vld [vmem:[%s296_s24] sm:$0xff]  ;;  %s860_s16 = sshll.u32 %s1384_s10, 4  ;;  %s845_s24 = scalar_lea.sflag [#allocation4], %s287_s7  ;;  %s861_s16 = int_to_ptr.vmem [resolvable:$true] %s860_s16 }
  0x1b   : > { %v333_v2 = vand.u32 2147483647, %v329_v1  ;;  %v330_v15 = vmax.f32 %v329_v1, 0.0  ;;  %vm331_vm2 = vcmp.ne.f32.partialorder %v329_v1, %v329_v1  ;;  %s1138_s9 = scalar_lea.hbm %s1444_s5, 32 }
  0x1c   : > { %v1332_v33 = vld [vmem:[#allocation2] sm:$0xff] }
  0x1d   : > { %v334_v3 = vsub.f32 0.0, %v333_v2  ;;  %502 = vmatpush.msra.mxu3 %v1332_v33  ;;  %v1343_v47 = vld [vmem:[#allocation2 + $0x8] sm:$0xff] }
  0x1f   : > { %v335_v4 = vmul.f32 1.442695, %v334_v3 }
  0x21   : > { %1092 = vpow2.f32 %v335_v4 }
  0x27   : > { %v1093_v7 = vpop.eup %1092 }
  0x28   : > { %v337_v8 = vadd.f32 1.0, %v1093_v7  ;;  %v340_v9 = vmul.f32 -0.5, %v1093_v7  ;;  %v343_v11 = vand.u32 2147483647, %v1093_v7 }
  0x2a   : > { %1094 = vlog2.f32 %v337_v8  ;;  %v341_v10 = vadd.f32 1.0, %v340_v9  ;;  %vm344_vm1 = vcmp.lt.f32.partialorder %v343_v11, 0.0004427343 }
  0x2c   : > { %v342_v13 = vmul.f32 %v1093_v7, %v341_v10 }
  0x30   : > { %v1095_v14 = vpop.eup %1094 }
  0x31   : > { %v339_v16 = vmul.f32 0.6931472, %v1095_v14 }
  0x33   : > { %v345_v19 = vsel %vm344_vm1, %v342_v13, %v339_v16 }
  0x34   : > { %v346_v20 = vadd.f32 %v345_v19, %v330_v15 }
  0x36   : > { %v347_v21 = vsel %vm331_vm2, %v329_v1, %v346_v20 }
  0x37   : > { %v348_v22 = vsub.f32 0.0, %v347_v21 }
  0x39   : > { %v349_v23 = vmul.f32 0.0625, %v348_v22 }
  0x3b   : > { %v350_v25 = vmul.f32 1.442695, %v349_v23  ;;  %383 = vmatpush.msra.mxu0 %v349_v23 }
  0x3c   : > { %1007 = vmatmul.msk.f32.vlgmr.msra.gmra.mxu0 %vm364_vm4, %v363_v24  ;;  %v1201_v24 = vmov 0  }
  0x3d   : > { %1096 = vpow2.f32 %v350_v25  ;;  %563 = vmatpush.msrb.mxu0 %v1303_v5  ;;  %1090 = vset.pattern.permute.xlu1 %v1201_v24 }
  0x43   : > { %v1097_v26 = vpop.eup %1096 }
  0x44   : > { %v1325_v28 = vsub.f32 1.0, %v1097_v26 }
  0x46   : > { %v353_v30 = vmul.f32 %v1325_v28, %v325_v27 }
  0x48   : > { %v357_v31 = vmul.f32 %v1091_v29, %v353_v30 }
  0x4a   : > { %770 = vrot.lane.b32.xlu1 %v357_v31, %s1200_s29  ;;  %v571_v46 = vsel %vm364_vm4, %v357_v31, 0.0 }
  0x74   : > { %572 = vadd.xlane.f32.xlu1 %v571_v46 }
  0x8c   : > { %v657_v32 = vpop.permute.xlu1 %656 }
  0x8d   : > { %762 = vmatpush.msra.mxu0 %v657_v32  ;;  %677 = vmatpush.msrb.mxu3 %v657_v32 }
  0xb9   : > { %v385_v34 = vpop.f32.mrf.mxu0 }
  0xba   : > { %v388_v35 = vmul.f32 1.442695, %v385_v34  ;;  %v392_v36 = vsub.f32 0.0, %v385_v34  ;;  %v396_v3 = vperm.slane %v385_v34, 7 }
  0xbc   : > { %1098 = vpow2.f32 %v388_v35  ;;  %v393_v37 = vmul.f32 1.442695, %v392_v36  ;;  %v771_v38 = vpop.permute.xlu1 %770  ;;  %v397_v4 = vsub.f32 %v396_v3, %v385_v34 }
  0xbd   : > { %v773_v39 = vsel %vm364_vm4, %v771_v38, 0.0 }
  0xbe   : > { %1100 = vpow2.f32 %v393_v37  ;;  %774 = vadd.xlane.f32.xlu2 %v773_v39  ;;  %v398_v6 = vmul.f32 1.442695, %v397_v4 }
  0xc2   : > { %v1099_v40 = vpop.eup %1098 }
  0xc3   : > { %v390_v41 = vmul.f32 %v1099_v40, %v325_v27  ;;  %v402_v45 = vrot.slane %v1099_v40, 7 }
  0xc4   : > { %v1101_v42 = vpop.eup %1100 }
  0xc5   : > { %v395_v43 = vmul.f32 %v1101_v42, %v1325_v28  ;;  %v391_v44 = vmul.f32 0.35355338, %v390_v41  ;;  %v1202_v42 = vmov 16.0  }
  0xc7   : > { %628 = vrot.lane.b32.xlu0 %v395_v43, %s1200_s29  ;;  %1008 = vmatpush.xpose.msk.msra.mxu1 %vm364_vm4, %v395_v43 }
  0xc8   : > { %1011 = vmatmul.msk.f32.vlgmr.msra.gmra.mxu3 %vm364_vm4, %v391_v44 }
  0xca   : > { %1009 = vmatmul.msk.f32.vlgmr.msra.gmra.mxu1 %vm364_vm4, %v391_v44 }
  0xcb   : > { %697 = vmatpush.msrb.mxu1 %v1343_v47 }
  0xcf   : > { %626 = vrot.lane.b32.xlu0 %v391_v44, %s1200_s29 }
  0xe7   : > { %v573_v15 = vpop.xlane.xlu1 %572 }
  0xe8   : > { %v574_v16 = vmul.f32 %v573_v15, %v1303_v5 }
  0xea   : > { %v1013_v19 = vmul.f32 -1.442695, %v574_v16 }
  0xf1   : > { %404 = vxpose.xlu0.b32.start.end [1/1] (short) (narrow) %v402_v45, 16 }
 0x131   : > { %v775_v48 = vpop.xlane.xlu2 %774 }
 0x132   : > { %v776_v49 = vmul.f32 %v775_v48, %v1303_v5 }
 0x134   : > { %v1019_v50 = vmul.f32 -1.442695, %v776_v49 }
 0x136   : > { %1102 = vpow2.f32 %v1019_v50 }
 0x139   : > { %v629_v51 = vpop.permute.xlu0 %628 }
 0x13a   : > { %1014 = vmatpush.xpose.msk.msrb.mxu2 %vm364_vm4, %v629_v51 }
 0x13c   : > { %v1103_v52 = vpop.eup %1102 }
 0x13d   : > { %v780_v53 = vadd.f32 1.0, %v1103_v52 }
 0x13f   : > { %1104 = vrcp.f32 %v780_v53  ;;  %vm786_vm5 = vweird.f32 %v780_v53  ;;  %v792_v58 = vand.u32 2147483648, %v780_v53  ;;  %v790_v61 = vand.u32 2147483647, %v780_v53 }
 0x140   : > { %1106 = vpow2.f32 %v398_v6 }
 0x141   : > { %v627_v54 = vpop.permute.xlu0 %626  ;;  %v793_v63 = vor.u32 1.1754944e-38, %v792_v58  ;;  %vm791_vm8 = vcmp.eq.f32.partialorder %v790_v61, 8.507059e+37  ;;  %1108 = vpow2.f32 %v1013_v19 }
 0x142   : > { %1017 = vmatmul.msk.f32.vlgmr.msrb.gmra.mxu1 %vm364_vm4, %v627_v54 }
 0x145   : > { %v1105_v55 = vpop.eup %1104 }
 0x146   : > { %v782_v56 = vmul.f32 %v1105_v55, %v780_v53  ;;  %vm787_vm6 = vweird.f32 %v1105_v55  ;;  %v1107_v7 = vpop.eup %1106 }
 0x147   : > { %v460_v57 = vpop.f32.mrf.mxu1  ;;  %vm788_vm7 = vmor %vm786_vm5, %vm787_vm6  ;;  %v400_v8 = vmul.f32 %v1107_v7, %v1325_v28  ;;  %v1109_v20 = vpop.eup %1108 }
 0x148   : > { %v463_v59 = vsel %vm362_vm3, %v460_v57, 0.0  ;;  %v783_v60 = vsub.f32 1.0, %v782_v56  ;;  %v578_v21 = vadd.f32 1.0, %v1109_v20 }
 0x149   : > { %1010 = vmatmul.msk.f32.vlgmr.msra.gmra.mxu2 %vm364_vm4, %v463_v59 }
 0x14a   : > { %v784_v62 = vmul.f32 %v1105_v55, %v783_v60  ;;  %1110 = vrcp.f32 %v578_v21  ;;  %vm584_vm9 = vweird.f32 %v578_v21  ;;  %v590_v5 = vand.u32 2147483648, %v578_v21 }
 0x14b   : > { %v504_v26 = vpop.f32.mrf.mxu3  ;;  %v588_v29 = vand.u32 2147483647, %v578_v21  ;;  %1112 = vrcp.f32 %v1202_v42 }
 0x14c   : > { %v785_v0 = vadd.f32 %v1105_v55, %v784_v62  ;;  %v591_v34 = vor.u32 1.1754944e-38, %v590_v5 }
 0x14d   : > { %vm589_vm12 = vcmp.eq.f32.partialorder %v588_v29, 8.507059e+37 }
 0x14e   : > { %v789_v1 = vsel %vm788_vm7, %v1105_v55, %v785_v0 }
 0x14f   : > { %v794_v2 = vsel %vm791_vm8, %v793_v63, %v789_v1 }
 0x150   : > { %797 = vrot.lane.b32.xlu2 %v794_v2, %s1198_s15  ;;  %v1111_v17 = vpop.eup %1110  ;;  %s859_s15 = scalar_lea.hbm %s1444_s5, %s1025_s12 }
 0x151   : > { %1015 = vmatmul.msk.f32.vlgmr.msrb.gmra.mxu2 %vm364_vm4, %v627_v54  ;;  %v580_v18 = vmul.f32 %v1111_v17, %v578_v21  ;;  %vm585_vm10 = vweird.f32 %v1111_v17  ;;  %v1113_v43 = vpop.eup %1112  ;;  %s862_s17 = sshll.u32 %s859_s15, 4  ;;  %s863_s17 = int_to_ptr.hbm [resolvable:$true] %s862_s17 }
 0x152   : > { %vm586_vm11 = vmor %vm584_vm9, %vm585_vm10  ;;  %v599_v44 = vmul.f32 16.0, %v1113_v43  ;;  %vm603_vm13 = vweird.f32 %v1113_v43  ;;  %s1132_s25 = sshra.s32 %s863_s17, 4  ;;  %s1133_s25 = int_to_ptr.hbm [resolvable:$true] %s1132_s25 }
 0x153   : > { %v581_v25 = vsub.f32 1.0, %v580_v18  ;;  %s1134_s27 = scalar_lea.hbm %s1133_s25, 16  ;;  %p1139_p1 = scmp.lt.s32.totalorder %s1133_s25, %s1444_s5 }
 0x154   : > { %v600_v46 = vsub.f32 1.0, %v599_v44  ;;  %p1135_p12 = scmp.ne.s32.totalorder %s1133_s25, %s1134_s27  ;;  %p1140_p2 = scmp.lt.s32.totalorder %s1138_s9, %s1134_s27 }
 0x155   : > { %v582_v27 = vmul.f32 %v1111_v17, %v581_v25 }
 0x156   : > { %v601_v48 = vmul.f32 %v1113_v43, %v600_v46  ;;  %p1136_p13 = pnand %p1135_p12, %p1276_p4  ;;  %p1141_p3 = por %p1140_p2, %p1139_p1 }
 0x157   : > { %v583_v28 = vadd.f32 %v1111_v17, %v582_v27 }
 0x158   : > { %v602_v49 = vadd.f32 %v1113_v43, %v601_v48  ;;  %p1137_p0 = pneg %p1136_p13 }
 0x159   : > { %v587_v36 = vsel %vm586_vm11, %v1111_v17, %v583_v28 }
 0x15a   : > { %v592_v39 = vsel %vm589_vm12, %v591_v34, %v587_v36  ;;  %v1368_v50 = vsel %vm603_vm13, %v1113_v43, %v602_v49  ;;  %p1142_p5 = pnand %p1141_p3, %p1137_p0 }
 0x167   : > { %709 = vrot.lane.b32.xlu0 %v400_v8, %s1200_s29 }
 0x176   : > { %513 = vxpose.xlu2.b32.start.end [1/1] (short) (narrow) %v400_v8, 8 }
 0x195   : > { %v420_v9 = vpop.trf.xlu0 }
 0x19d   : > { %v1357_v11 = vpop.trf.xlu0 }
 0x1aa   : > { %v798_v22 = vpop.permute.xlu2 %797 }
 0x1bf   : > { %v699_v30 = vpop.f32.mrf.mxu1 }
 0x1cc   : > { %v484_v10 = vpop.f32.mrf.mxu2 }
 0x1cd   : > { %v505_v37 = vadd.f32 %v504_v26, %v484_v10 }
 0x1cf   : > { %v594_v40 = vadd.f32 %v592_v39, %v505_v37 }
 0x1d1   : > { %v595_v41 = vsel %vm322_vm0, %v594_v40, 0.0 }
 0x1d4   : > { %v651_v12 = vpop.f32.mrf.mxu2 }
 0x1d5   : > { %v654_v13 = vsel %vm362_vm3, %v651_v12, 0.0 }
 0x1d6   : > { %1016 = vmatmul.msk.f32.vlgmr.msrb.gmra.mxu3 %vm364_vm4, %v654_v13 }
 0x1d9   : > { %v710_v14 = vpop.permute.xlu0 %709 }
 0x1da   : > { %712 = vxpose.xlu0.b32.start.end [1/1] (short) (narrow) %v710_v14, 8 }
 0x20f   : > { %v529_v23 = vpop.trf.xlu2 }
 0x210   : > { %1012 = vmatmul.msk.f32.vlgmr.msrb.gmra.mxu0 %vm364_vm4, %v529_v23 }
 0x241   : > { %1089 = vset.pattern.permute.xlu0 %v1201_v24 }
 0x248   : > { %509 = vperm.xlu0 %1089, %v420_v9  }
 0x259   : > { %v679_v31 = vpop.f32.mrf.mxu3 }
 0x25a   : > { %v700_v32 = vadd.f32 %v699_v30, %v679_v31 }
 0x25c   : > { %v800_v35 = vadd.f32 %v798_v22, %v700_v32 }
 0x25e   : > { %v801_v38 = vsel %vm322_vm0, %v800_v35, 0.0 }
 0x25f   : > { %802 = vadd.xlane.f32.xlu1 %v801_v38 }
 0x267   : > { %596 = vadd.xlane.f32.xlu1 %v595_v41 }
 0x27e   : > { %v728_v45 = vpop.trf.xlu0 }
 0x27f   : > { %1018 = vmatmul.msk.f32.vlgmr.msra.gmra.mxu0 %vm364_vm4, %v728_v45 }
 0x28d   : > { %v565_v59 = vpop.f32.mrf.mxu0 }
 0x2ba   : > { %v510_v58 = vpop.permute.xlu0 %509 }
 0x2bb   : > { %v512_v60 = vmul.f32 %v510_v58, %v1332_v33 }
 0x2bd   : > { %v568_v62 = vadd.f32 %v565_v59, %v512_v60 }
 0x2bf   : > { %570 = vst.msk [vmem:[#allocation2] sm:$0xff] %vm322_vm0, %v568_v62 }
 0x2c6   : > { %v833_v1 = vld [vmem:[#allocation2] sm:$0xff] }
 0x2c7   : > { %835 = vst.msk [vmem:[%s1384_s10] sm:$0xff] %vm322_vm0, %v833_v1 }
 0x2d2   : > { %v803_v51 = vpop.xlane.xlu1 %802 }
 0x2d3   : > { %v804_v52 = vmul.f32 %v803_v51, %v1368_v50 }
 0x2d5   : > { %v805_v53 = vsub.f32 %v800_v35, %v804_v52 }
 0x2d7   : > { %v806_v54 = vmul.f32 %v805_v53, %v805_v53 }
 0x2d9   : > { %v807_v55 = vsel %vm322_vm0, %v806_v54, 0.0 }
 0x2da   : > { %808 = vadd.xlane.f32.xlu2 %v807_v55  ;;  %v597_v56 = vpop.xlane.xlu1 %596 }
 0x2db   : > { %v605_v57 = vmul.f32 %v1368_v50, %v597_v56 }
 0x2dd   : > { %v1374_v61 = vsub.f32 %v594_v40, %v605_v57 }
 0x2df   : > { %v607_v63 = vmul.f32 %v1374_v61, %v1374_v61 }
 0x2e1   : > { %v608_v0 = vsel %vm322_vm0, %v607_v63, 0.0 }
 0x2e2   : > { %609 = vadd.xlane.f32.xlu1 %v608_v0 }
 0x2fb   : > { %704 = vperm.xlu1 %1090, %v1357_v11  }
 0x2fc   : > { %v764_v15 = vpop.f32.mrf.mxu0 }
 0x34d   : > { %v809_v33 = vpop.xlane.xlu2 %808 }
 0x34e   : > { %v810_v2 = vmul.f32 %v809_v33, %v1368_v50 }
 0x350   : > { %v811_v3 = vadd.f32 1e-05, %v810_v2 }
 0x352   : > { %1114 = vrsqrt.f32 %v811_v3  ;;  %vm818_vm15 = vweird.f32 %v811_v3 }
 0x355   : > { %v610_v13 = vpop.xlane.xlu1 %609 }
 0x358   : > { %v1115_v4 = vpop.eup %1114 }
 0x359   : > { %v813_v6 = vmul.f32 %v1115_v4, %v811_v3  ;;  %vm819_vm14 = vweird.f32 %v1115_v4 }
 0x35a   : > { %vm820_vm1 = vmor %vm818_vm15, %vm819_vm14 }
 0x35b   : > { %v814_v7 = vmul.f32 %v1115_v4, %v813_v6 }
 0x35d   : > { %v815_v8 = vmul.f32 0.5, %v814_v7 }
 0x35f   : > { %v816_v9 = vsub.f32 1.5, %v815_v8 }
 0x361   : > { %v817_v10 = vmul.f32 %v1115_v4, %v816_v9 }
 0x363   : > { %v821_v11 = vsel %vm820_vm1, %v1115_v4, %v817_v10 }
 0x364   : > { %v822_v12 = vmul.f32 %v821_v11, %v805_v53 }
 0x366   : > { %824 = vrot.lane.b32.xlu1 %v822_v12, %s1203_s11 }
 0x36d   : > { %v705_v14 = vpop.permute.xlu1 %704 }
 0x36e   : > { %v707_v16 = vmul.f32 %v705_v14, %v1343_v47 }
 0x370   : > { %v767_v19 = vadd.f32 %v764_v15, %v707_v16 }
 0x372   : > { %768 = vst.msk [vmem:[#allocation2 + $0x8] sm:$0xff] %vm322_vm0, %v767_v19 }
 0x379   : > { %v834_v20 = vld [vmem:[#allocation2 + $0x8] sm:$0xff] }
 0x37a   : > { %836 = vst.msk [vmem:[%s1384_s10 + $0x8] sm:$0xff] %vm322_vm0, %v834_v20 }
 0x37b   : > { %1145 = shalt.err (!%p1142_p5)
}
 0x37c   : > { %s1204_s7 = smov 128   ;;  %s1205_s10 = smov 8   ;;  %v611_v47 = vmul.f32 %v610_v13, %v1368_v50  ;;  %vm828_vm5 = vcmask 261120  }
 0x37d   : > { %1026 = dma.vmem_to_hbm [thread:$0]  (%p1276_p4), %s861_s16, 256, %s863_s17, %s845_s24, %s1204_s7, %s1204_s7, %s1205_s10  }
 0x37e   : > { %v612_v21 = vadd.f32 1e-05, %v611_v47  ;;  %s317_s15 = scalar_lea.vmem %s1443_s4, %s1293_s8 }
 0x380   : > { %1116 = vrsqrt.f32 %v612_v21  ;;  %vm619_vm3 = vweird.f32 %v612_v21 }
 0x386   : > { %v1117_v22 = vpop.eup %1116 }
 0x387   : > { %v614_v23 = vmul.f32 %v1117_v22, %v612_v21  ;;  %vm620_vm2 = vweird.f32 %v1117_v22 }
 0x388   : > { %vm621_vm4 = vmor %vm619_vm3, %vm620_vm2 }
 0x389   : > { %v615_v24 = vmul.f32 %v1117_v22, %v614_v23 }
 0x38b   : > { %v616_v17 = vmul.f32 0.5, %v615_v24 }
 0x38d   : > { %v617_v18 = vsub.f32 1.5, %v616_v17 }
 0x38f   : > { %v618_v25 = vmul.f32 %v1117_v22, %v617_v18 }
 0x391   : > { %v622_v26 = vsel %vm621_vm4, %v1117_v22, %v618_v25 }
 0x392   : > { %v623_v27 = vmul.f32 %v622_v26, %v1374_v61 }
 0x3d8   : > { %v825_v5 = vpop.permute.xlu1 %824 }
 0x3d9   : > { %v827_v28 = vsel %vm322_vm0, %v623_v27, %v825_v5 }
 0x3da   : > { %829 = vst.msk [vmem:[%s317_s15] sm:$0xff] %vm828_vm5, %v827_v28 }
 0x3db PF: > { %p1032_p4 = scmp.ge.s32.totalorder %s1196_s23, 2  ;;  %s887_s28 = sand.u32 1, %s1176_s18  }
 0x3dc   : > { %s888_s16 = scalar_lea.sflag [#allocation4], %s887_s28 }
 0x3dd   : > { %p1029_p6 = pnand %p1032_p4, %p1283_p8 }
 0x3df   : > { %p1030_p7 = pneg %p1029_p6 }
 0x3e1   : > { %1171 = dma.done.wait (%p1030_p7), %s888_s16, 256  }
 0x3e2   : > { %1173 = vsyncadd (%p1030_p7), %s888_s16, 4294967040  ;;  %s19_s23 = sadd.s32 1, %s1196_s23   ;;  %s1447_s18 = smov %s1180_s19 }
 0x3e3   : > { %p16_p9 = scmp.ge.s32.totalorder %s19_s23, 4   ;;  %s1448_s19 = smov %s1184_s20 }
 0x3e4   : > { %s1449_s20 = smov %s1289_s6  ;;  %s1450_s21 = smov %s1192_s22 }
 0x3e5   : > { %s1451_s22 = smov %s1453_s26  ;;  %18 = sbr.rel (!%p16_p9) target bundleno = 4 (0x4), region = 98 }
 0x3ea   :  { %894 = vsyncpa [#allocation4], 1 }
 0x3eb   :  { %896 = vsyncpa [#allocation4 + $0x1], 1 }

</bundles_post_ra>
